<compile_context>
chip_gen: v7x
topology: tpu7x:2x2x1
jax: 0.10.0
libtpu: 0.0.40
codegen_flags: <defaults>
</compile_context>

<pallas_src>
import functools

import jax
import jax.numpy as jnp
from jax.experimental import pallas as pl
from jax.experimental.pallas import tpu as pltpu


# ----------------------------------------------------------------------------
# Kernel: one (direction, time-chunk) grid step. h/c live in VMEM scratch and
# carry across the time-chunk ("arbitrary") grid axis. Gate order in the packed
# weights is [i, f, o, g] (repacked from PyTorch's [i, f, g, o] in the wrapper).
# ----------------------------------------------------------------------------
def _bilstm_dir_kernel(gx_ref, whh_ref, out_ref, h_scr, c_scr,
                       *, hidden, chunk, unroll):
    # gx_ref : (Tc, Bp, 4H)  precomputed x_t @ W_ih^T + (b_ih + b_hh)
    # whh_ref: (H, 4H)       recurrent weights (transposed)
    # out_ref: (Tc, Bp, H)   hidden state per timestep for this direction/chunk
    # h_scr/c_scr: (Bp, H) f32 recurrent state, carried across time chunks
    d = pl.program_id(0)          # 0 = forward, 1 = backward
    H = hidden

    @pl.when(pl.program_id(1) == 0)
    def _init():
        h_scr[...] = jnp.zeros_like(h_scr)
        c_scr[...] = jnp.zeros_like(c_scr)

    def step_at(t):
        # Recurrent matmul streams W_hh from VMEM (not hoisted into vregs).
        gates = gx_ref[t].astype(jnp.float32) + jnp.dot(
            h_scr[...].astype(whh_ref.dtype), whh_ref[...],
            preferred_element_type=jnp.float32)              # (Bp, 4H)
        ifo = jax.nn.sigmoid(gates[:, :3 * H])               # one contiguous slab: i,f,o
        g = jnp.tanh(gates[:, 3 * H:])
        c_new = ifo[:, H:2 * H] * c_scr[...] + ifo[:, :H] * g
        h_new = ifo[:, 2 * H:3 * H] * jnp.tanh(c_new)
        c_scr[...] = c_new
        h_scr[...] = h_new
        out_ref[t] = h_new.astype(out_ref.dtype)

    def _run(order_fn):
        def body(s, carry):
            step_at(order_fn(s))
            return carry
        jax.lax.fori_loop(0, chunk, body, 0, unroll=unroll)

    @pl.when(d == 0)
    def _forward():
        _run(lambda s: s)                     # t = s (affine)

    @pl.when(d != 0)
    def _backward():
        _run(lambda s: chunk - 1 - s)         # t = Tc-1-s (affine)


def _run_directions(gx, whh, hidden, time_chunk, out_dtype, unroll):
    """gx: (2, Tp, Bp, 4H), whh: (2, H, 4H) -> (2, Tp, Bp, H)."""
    ndir, Tp, Bp, G = gx.shape
    H = hidden
    nT = Tp // time_chunk
    kernel = functools.partial(_bilstm_dir_kernel,
                               hidden=H, chunk=time_chunk, unroll=unroll)

    def tmap(d, c):
        # forward walks chunks 0..nT-1, backward walks nT-1..0 (pure int affine map)
        return (d, c + d * (nT - 1 - 2 * c), 0, 0)

    return pl.pallas_call(
        kernel,
        out_shape=jax.ShapeDtypeStruct((ndir, Tp, Bp, H), out_dtype),
        grid_spec=pltpu.PrefetchScalarGridSpec(
            num_scalar_prefetch=0,
            grid=(ndir, nT),
            in_specs=[
                pl.BlockSpec((None, time_chunk, Bp, G), tmap),          # gates_x chunk
                pl.BlockSpec((None, H, G), lambda d, c: (d, 0, 0)),     # W_hh^T
            ],
            out_specs=pl.BlockSpec((None, time_chunk, Bp, H), tmap),
            scratch_shapes=[
                pltpu.VMEM((Bp, H), jnp.float32),   # h carry
                pltpu.VMEM((Bp, H), jnp.float32),   # c carry
            ],
        ),
        compiler_params=pltpu.CompilerParams(
            dimension_semantics=("parallel", "arbitrary"),  # directions -> cores (v7x)
            vmem_limit_bytes=64 * 1024 * 1024,
        ),
    )(gx, whh)


# ----------------------------------------------------------------------------
# Helpers: gate repacking and time-chunk sizing.
# ----------------------------------------------------------------------------
def _to_kernel_gate_order(a, hidden):
    """PyTorch packs gates [i, f, g, o]; kernel wants [i, f, o, g]."""
    H = hidden
    return jnp.concatenate(
        [a[..., :2 * H], a[..., 3 * H:4 * H], a[..., 2 * H:3 * H]], axis=-1)


def _pick_time_chunk(T, Bp, hidden, itemsize, budget_bytes=40 * 1024 * 1024):
    # Streamed, double-buffered per-chunk blocks: gx (Bp,4H) + out (Bp,H).
    per_step = 2 * Bp * 5 * hidden * itemsize
    return int(max(1, min(T, 256, budget_bytes // max(per_step, 1))))


# ----------------------------------------------------------------------------
# BiLSTMPretraining.forward: out, _ = nn.LSTM(..., bidirectional=True)(x)
# x: (B, T, D) batch_first. Returns (B, T, 2H) float32.
# ----------------------------------------------------------------------------
def bilstm_forward(x_btd, params, hidden, num_layers, compute_dtype=jnp.bfloat16):
    B, T, _ = x_btd.shape
    H = hidden
    cdt = jnp.dtype(compute_dtype)
    sub = 16 if cdt.itemsize == 2 else 8                 # sublane packing (bf16 / f32)
    Bp = ((B + sub - 1) // sub) * sub
    prec = jax.lax.Precision.HIGHEST if cdt == jnp.dtype(jnp.float32) else None

    tc = _pick_time_chunk(T, Bp, H, cdt.itemsize)
    nT = -(-T // tc)
    Tp = nT * tc
    unroll = True if tc <= 32 else 8

    x = jnp.transpose(x_btd, (1, 0, 2)).astype(cdt)      # (T, B, D)
    if Bp != B:
        x = jnp.pad(x, ((0, 0), (0, Bp - B), (0, 0)))    # rows are independent

    prev = None                                          # (2, T, Bp, H) from prev layer
    for layer in range(num_layers):
        p = params[layer]
        w_ih = _to_kernel_gate_order(jnp.stack([p["w_ih_f"], p["w_ih_b"]]), H).astype(cdt)
        w_hh = _to_kernel_gate_order(jnp.stack([p["w_hh_f"], p["w_hh_b"]]), H).astype(cdt)
        bias = _to_kernel_gate_order(jnp.stack([p["b_f"], p["b_b"]]), H)     # f32 (2,4H)

        if layer == 0:
            # One batched projection for both directions -> stacked layout directly.
            gx = jnp.einsum("tbd,kdg->ktbg", x, w_ih,
                            preferred_element_type=jnp.float32, precision=prec)
        else:
            # Consume previous layer's (2, T, Bp, H) output directly; splitting W_ih
            # over the two halves avoids materializing the (T, Bp, 2H) concatenation.
            w_split = w_ih.reshape(2, 2, H, 4 * H)       # [dir, input half, H, 4H]
            gx = jnp.einsum("ktbh,jkhg->jtbg", prev, w_split,
                            preferred_element_type=jnp.float32, precision=prec)
        gx = (gx + bias[:, None, None, :]).astype(cdt)   # (2, T, Bp, 4H)

        if Tp != T:
            # Pad time with "dead" steps: i-gate pinned hard negative so padded steps
            # keep h = c = 0 (they are the FIRST steps the backward direction sees);
            # their outputs are sliced off below.
            pad = jnp.concatenate(
                [jnp.full((2, Tp - T, Bp, H), -1e4, cdt),
                 jnp.zeros((2, Tp - T, Bp, 3 * H), cdt)], axis=-1)
            gx = jnp.concatenate([gx, pad], axis=1)

        out = _run_directions(gx, w_hh, H, tc, cdt, unroll)   # (2, Tp, Bp, H)
        prev = out[:, :T]

    # TODO(synk): write the fused (T, Bp, 2H) output directly from the kernel once H
    # is guaranteed to be a multiple of 128 (lane-block out_specs per direction).
    y = jnp.concatenate([prev[0], prev[1]], axis=-1)     # (T, Bp, 2H), final layer only
    return jnp.transpose(y[:, :B], (1, 0, 2)).astype(jnp.float32)


# ----------------------------------------------------------------------------
# Deterministic parameter init (PyTorch-style uniform(-1/sqrt(H), 1/sqrt(H))),
# stored transposed in torch gate order [i, f, g, o]; bias folded b_ih + b_hh.
# ----------------------------------------------------------------------------
def init_params(key, input_size, hidden, num_layers):
    params = []
    bound = 1.0 / float(hidden) ** 0.5
    for layer in range(num_layers):
        d_in = input_size if layer == 0 else 2 * hidden
        lp = {}
        for tag in ("f", "b"):
            key, k1, k2, k3, k4 = jax.random.split(key, 5)
            lp["w_ih_" + tag] = jax.random.uniform(
                k1, (d_in, 4 * hidden), jnp.float32, -bound, bound)
            lp["w_hh_" + tag] = jax.random.uniform(
                k2, (hidden, 4 * hidden), jnp.float32, -bound, bound)
            b_ih = jax.random.uniform(k3, (4 * hidden,), jnp.float32, -bound, bound)
            b_hh = jax.random.uniform(k4, (4 * hidden,), jnp.float32, -bound, bound)
            lp["b_" + tag] = b_ih + b_hh
        params.append(lp)
    return params


# ----------------------------------------------------------------------------
# Pure-JAX reference (mirrors torch.nn.LSTM semantics, full f32 precision).
# ----------------------------------------------------------------------------
def _lstm_dir_ref(x_tbd, w_ih, w_hh, b, hidden, reverse):
    T, B, _ = x_tbd.shape
    hi = jax.lax.Precision.HIGHEST
    h = jnp.zeros((B, hidden), jnp.float32)
    c = jnp.zeros((B, hidden), jnp.float32)
    order = range(T - 1, -1, -1) if reverse else range(T)
    outs = [None] * T
    for t in order:
        gates = (jnp.dot(x_tbd[t], w_ih, precision=hi)
                 + jnp.dot(h, w_hh, precision=hi) + b)
        i = jax.nn.sigmoid(gates[:, :hidden])
        f = jax.nn.sigmoid(gates[:, hidden:2 * hidden])
        g = jnp.tanh(gates[:, 2 * hidden:3 * hidden])
        o = jax.nn.sigmoid(gates[:, 3 * hidden:])
        c = f * c + i * g
        h = o * jnp.tanh(c)
        outs[t] = h
    return jnp.stack(outs, axis=0)


def bilstm_forward_ref(x_btd, params, hidden, num_layers):
    x = jnp.transpose(x_btd, (1, 0, 2))
    for layer in range(num_layers):
        p = params[layer]
        of = _lstm_dir_ref(x, p["w_ih_f"], p["w_hh_f"], p["b_f"], hidden, reverse=False)
        ob = _lstm_dir_ref(x, p["w_ih_b"], p["w_hh_b"], p["b_b"], hidden, reverse=True)
        x = jnp.concatenate([of, ob], axis=-1)
    return jnp.transpose(x, (1, 0, 2))


if __name__ == "__main__":
    B, T = 2, 8
    INPUT_SIZE, HIDDEN, NUM_LAYERS = 16, 32, 2

    key = jax.random.PRNGKey(0)
    kx, kp = jax.random.split(key)
    x = jax.random.normal(kx, (B, T, INPUT_SIZE), jnp.float32)
    params = init_params(kp, INPUT_SIZE, HIDDEN, NUM_LAYERS)

    ref = bilstm_forward_ref(x, params, HIDDEN, NUM_LAYERS)

    # f32 numerics path: tight check of the Pallas recurrence.
    fwd_f32 = jax.jit(functools.partial(bilstm_forward, hidden=HIDDEN,
                                        num_layers=NUM_LAYERS,
                                        compute_dtype=jnp.float32))
    out32 = jax.block_until_ready(fwd_f32(x, params))
    assert out32.shape == (B, T, 2 * HIDDEN), out32.shape
    err32 = float(jnp.max(jnp.abs(out32 - ref)))
    assert jnp.allclose(out32, ref, rtol=2e-3, atol=2e-3), err32

    # bf16 storage/matmul path (production numerics: bf16 gx/activations/W_hh,
    # f32 gate & cell math) — looser tolerance vs the f32 reference.
    fwd_bf16 = jax.jit(functools.partial(bilstm_forward, hidden=HIDDEN,
                                         num_layers=NUM_LAYERS,
                                         compute_dtype=jnp.bfloat16))
    out16 = jax.block_until_ready(fwd_bf16(x, params))
    err16 = float(jnp.max(jnp.abs(out16 - ref)))
    assert jnp.allclose(out16, ref, rtol=5e-2, atol=5e-2), err16

    print("KERNEL_OK")
</pallas_src>

<mosaic_0001>
module attributes {stable_mosaic.version = 11 : i64} {
  func.func @_bilstm_dir_kernel(%arg0: i32, %arg1: i32, %arg2: memref<1x8x8x128xf32, #tpu.memory_space<vmem>>, %arg3: memref<1x32x128xf32, #tpu.memory_space<vmem>>, %arg4: memref<1x8x8x32xf32, #tpu.memory_space<vmem>>, %arg5: memref<8x32xf32, #tpu.memory_space<vmem>>, %arg6: memref<8x32xf32, #tpu.memory_space<vmem>>) attributes {dimension_semantics = [#tpu.dimension_semantics<parallel>, #tpu.dimension_semantics<arbitrary>], iteration_bounds = array<i64: 2, 1>, scalar_prefetch = 0 : i64, scratch_operands = 2 : i64, tpu.core_type = #tpu.core_type<tc>, window_params = [{transform_indices = @transform_0, window_bounds = array<i64: 1, 8, 8, 128>}, {transform_indices = @transform_1, window_bounds = array<i64: 1, 32, 128>}, {transform_indices = @transform_2, window_bounds = array<i64: 1, 8, 8, 32>}]} {
    %c0_i32 = arith.constant 0 : i32
    %0 = arith.cmpi eq, %arg1, %c0_i32 : i32
    %1 = arith.extui %0 : i1 to i32
    %c0_i32_0 = arith.constant 0 : i32
    %2 = arith.cmpi ne, %1, %c0_i32_0 : i32
    scf.if %2 {
      %cst = arith.constant 0.000000e+00 : f32
      %9 = vector.broadcast %cst : f32 to vector<8x32xf32>
      %c0 = arith.constant 0 : index
      %c0_5 = arith.constant 0 : index
      %10 = vector.load %arg5[%c0, %c0_5] : memref<8x32xf32, #tpu.memory_space<vmem>>, vector<8x32xf32>
      tpu.vector_store %arg5[%c0, %c0_5], %9 {strides = array<i32>} : memref<8x32xf32, #tpu.memory_space<vmem>>, vector<8x32xf32>,
      %cst_6 = arith.constant 0.000000e+00 : f32
      %11 = vector.broadcast %cst_6 : f32 to vector<8x32xf32>
      %c0_7 = arith.constant 0 : index
      %c0_8 = arith.constant 0 : index
      %12 = vector.load %arg6[%c0_7, %c0_8] : memref<8x32xf32, #tpu.memory_space<vmem>>, vector<8x32xf32>
      tpu.vector_store %arg6[%c0_7, %c0_8], %11 {strides = array<i32>} : memref<8x32xf32, #tpu.memory_space<vmem>>, vector<8x32xf32>,
    } else {
    }
    %c0_i32_1 = arith.constant 0 : i32
    %3 = arith.cmpi eq, %arg0, %c0_i32_1 : i32
    %4 = arith.extui %3 : i1 to i32
    %c0_i32_2 = arith.constant 0 : i32
    %5 = arith.cmpi ne, %4, %c0_i32_2 : i32
    scf.if %5 {
      %c0_i32_5 = arith.constant 0 : i32
      %c0 = arith.constant 0 : index
      %9 = arith.index_cast %c0_i32_5 : i32 to index
      %c0_6 = arith.constant 0 : index
      %c0_7 = arith.constant 0 : index
      %10 = vector.load %arg2[%c0, %9, %c0_6, %c0_7] : memref<1x8x8x128xf32, #tpu.memory_space<vmem>>, vector<1x1x8x128xf32>
      %11 = vector.shape_cast %10 : vector<1x1x8x128xf32> to vector<8x128xf32>
      %c0_8 = arith.constant 0 : index
      %c0_9 = arith.constant 0 : index
      %12 = vector.load %arg5[%c0_8, %c0_9] : memref<8x32xf32, #tpu.memory_space<vmem>>, vector<8x32xf32>
      %c0_10 = arith.constant 0 : index
      %c0_11 = arith.constant 0 : index
      %c0_12 = arith.constant 0 : index
      %13 = vector.load %arg3[%c0_10, %c0_11, %c0_12] : memref<1x32x128xf32, #tpu.memory_space<vmem>>, vector<1x32x128xf32>
      %14 = vector.shape_cast %13 : vector<1x32x128xf32> to vector<32x128xf32>
      %cst = arith.constant dense<0.000000e+00> : vector<8x128xf32>
      %15 = tpu.matmul %12, %14, %cst {dimension_numbers = #tpu.dot_dimension_numbers<[1], [0], [0], [1], [0, 0, 1, 1], [], []>} : vector<8x32xf32>, vector<32x128xf32>, vector<8x128xf32> -> vector<8x128xf32>
      %16 = arith.addf %11, %15 : vector<8x128xf32>
      %17 = vector.extract_strided_slice %16 {offsets = [0, 0], sizes = [8, 96], strides = [1, 1]} : vector<8x128xf32> to vector<8x96xf32>
      %18 = arith.negf %17 : vector<8x96xf32>
      %19 = math.exp %18 : vector<8x96xf32>
      %cst_13 = arith.constant 1.000000e+00 : f32
      %20 = vector.broadcast %cst_13 : f32 to vector<8x96xf32>
      %21 = arith.addf %20, %19 : vector<8x96xf32>
      %22 = arith.divf %20, %21 : vector<8x96xf32>
      %23 = vector.extract_strided_slice %16 {offsets = [0, 96], sizes = [8, 32], strides = [1, 1]} : vector<8x128xf32> to vector<8x32xf32>
      %24 = math.tanh %23 : vector<8x32xf32>
      %25 = vector.extract_strided_slice %22 {offsets = [0, 32], sizes = [8, 32], strides = [1, 1]} : vector<8x96xf32> to vector<8x32xf32>
      %c0_14 = arith.constant 0 : index
      %c0_15 = arith.constant 0 : index
      %26 = vector.load %arg6[%c0_14, %c0_15] : memref<8x32xf32, #tpu.memory_space<vmem>>, vector<8x32xf32>
      %27 = arith.mulf %25, %26 : vector<8x32xf32>
      %28 = vector.extract_strided_slice %22 {offsets = [0, 0], sizes = [8, 32], strides = [1, 1]} : vector<8x96xf32> to vector<8x32xf32>
      %29 = arith.mulf %28, %24 : vector<8x32xf32>
      %30 = arith.addf %27, %29 : vector<8x32xf32>
      %31 = vector.extract_strided_slice %22 {offsets = [0, 64], sizes = [8, 32], strides = [1, 1]} : vector<8x96xf32> to vector<8x32xf32>
      %32 = math.tanh %30 : vector<8x32xf32>
      %33 = arith.mulf %31, %32 : vector<8x32xf32>
      %c0_16 = arith.constant 0 : index
      %c0_17 = arith.constant 0 : index
      %34 = vector.load %arg6[%c0_16, %c0_17] : memref<8x32xf32, #tpu.memory_space<vmem>>, vector<8x32xf32>
      tpu.vector_store %arg6[%c0_16, %c0_17], %30 {strides = array<i32>} : memref<8x32xf32, #tpu.memory_space<vmem>>, vector<8x32xf32>,
      %c0_18 = arith.constant 0 : index
      %c0_19 = arith.constant 0 : index
      %35 = vector.load %arg5[%c0_18, %c0_19] : memref<8x32xf32, #tpu.memory_space<vmem>>, vector<8x32xf32>
      tpu.vector_store %arg5[%c0_18, %c0_19], %33 {strides = array<i32>} : memref<8x32xf32, #tpu.memory_space<vmem>>, vector<8x32xf32>,
      %c0_20 = arith.constant 0 : index
      %36 = arith.index_cast %c0_i32_5 : i32 to index
      %c0_21 = arith.constant 0 : index
      %c0_22 = arith.constant 0 : index
      %37 = vector.load %arg4[%c0_20, %36, %c0_21, %c0_22] : memref<1x8x8x32xf32, #tpu.memory_space<vmem>>, vector<1x1x8x32xf32>
      %38 = vector.shape_cast %37 : vector<1x1x8x32xf32> to vector<8x32xf32>
      %39 = vector.shape_cast %33 : vector<8x32xf32> to vector<1x1x8x32xf32>
      tpu.vector_store %arg4[%c0_20, %36, %c0_21, %c0_22], %39 {strides = array<i32>} : memref<1x8x8x32xf32, #tpu.memory_space<vmem>>, vector<1x1x8x32xf32>,
      %c1_i32 = arith.constant 1 : i32
      %c0_23 = arith.constant 0 : index
      %40 = arith.index_cast %c1_i32 : i32 to index
      %c0_24 = arith.constant 0 : index
      %c0_25 = arith.constant 0 : index
      %41 = vector.load %arg2[%c0_23, %40, %c0_24, %c0_25] : memref<1x8x8x128xf32, #tpu.memory_space<vmem>>, vector<1x1x8x128xf32>
      %42 = vector.shape_cast %41 : vector<1x1x8x128xf32> to vector<8x128xf32>
      %c0_26 = arith.constant 0 : index
      %c0_27 = arith.constant 0 : index
      %43 = vector.load %arg5[%c0_26, %c0_27] : memref<8x32xf32, #tpu.memory_space<vmem>>, vector<8x32xf32>
      %c0_28 = arith.constant 0 : index
      %c0_29 = arith.constant 0 : index
      %c0_30 = arith.constant 0 : index
      %44 = vector.load %arg3[%c0_28, %c0_29, %c0_30] : memref<1x32x128xf32, #tpu.memory_space<vmem>>, vector<1x32x128xf32>
      %45 = vector.shape_cast %44 : vector<1x32x128xf32> to vector<32x128xf32>
      %cst_31 = arith.constant dense<0.000000e+00> : vector<8x128xf32>
      %46 = tpu.matmul %43, %45, %cst_31 {dimension_numbers = #tpu.dot_dimension_numbers<[1], [0], [0], [1], [0, 0, 1, 1], [], []>} : vector<8x32xf32>, vector<32x128xf32>, vector<8x128xf32> -> vector<8x128xf32>
      %47 = arith.addf %42, %46 : vector<8x128xf32>
      %48 = vector.extract_strided_slice %47 {offsets = [0, 0], sizes = [8, 96], strides = [1, 1]} : vector<8x128xf32> to vector<8x96xf32>
      %49 = arith.negf %48 : vector<8x96xf32>
      %50 = math.exp %49 : vector<8x96xf32>
      %cst_32 = arith.constant 1.000000e+00 : f32
      %51 = vector.broadcast %cst_32 : f32 to vector<8x96xf32>
      %52 = arith.addf %51, %50 : vector<8x96xf32>
      %53 = arith.divf %51, %52 : vector<8x96xf32>
      %54 = vector.extract_strided_slice %47 {offsets = [0, 96], sizes = [8, 32], strides = [1, 1]} : vector<8x128xf32> to vector<8x32xf32>
      %55 = math.tanh %54 : vector<8x32xf32>
      %56 = vector.extract_strided_slice %53 {offsets = [0, 32], sizes = [8, 32], strides = [1, 1]} : vector<8x96xf32> to vector<8x32xf32>
      %c0_33 = arith.constant 0 : index
      %c0_34 = arith.constant 0 : index
      %57 = vector.load %arg6[%c0_33, %c0_34] : memref<8x32xf32, #tpu.memory_space<vmem>>, vector<8x32xf32>
      %58 = arith.mulf %56, %57 : vector<8x32xf32>
      %59 = vector.extract_strided_slice %53 {offsets = [0, 0], sizes = [8, 32], strides = [1, 1]} : vector<8x96xf32> to vector<8x32xf32>
      %60 = arith.mulf %59, %55 : vector<8x32xf32>
      %61 = arith.addf %58, %60 : vector<8x32xf32>
      %62 = vector.extract_strided_slice %53 {offsets = [0, 64], sizes = [8, 32], strides = [1, 1]} : vector<8x96xf32> to vector<8x32xf32>
      %63 = math.tanh %61 : vector<8x32xf32>
      %64 = arith.mulf %62, %63 : vector<8x32xf32>
      %c0_35 = arith.constant 0 : index
      %c0_36 = arith.constant 0 : index
      %65 = vector.load %arg6[%c0_35, %c0_36] : memref<8x32xf32, #tpu.memory_space<vmem>>, vector<8x32xf32>
      tpu.vector_store %arg6[%c0_35, %c0_36], %61 {strides = array<i32>} : memref<8x32xf32, #tpu.memory_space<vmem>>, vector<8x32xf32>,
      %c0_37 = arith.constant 0 : index
      %c0_38 = arith.constant 0 : index
      %66 = vector.load %arg5[%c0_37, %c0_38] : memref<8x32xf32, #tpu.memory_space<vmem>>, vector<8x32xf32>
      tpu.vector_store %arg5[%c0_37, %c0_38], %64 {strides = array<i32>} : memref<8x32xf32, #tpu.memory_space<vmem>>, vector<8x32xf32>,
      %c0_39 = arith.constant 0 : index
      %67 = arith.index_cast %c1_i32 : i32 to index
      %c0_40 = arith.constant 0 : index
      %c0_41 = arith.constant 0 : index
      %68 = vector.load %arg4[%c0_39, %67, %c0_40, %c0_41] : memref<1x8x8x32xf32, #tpu.memory_space<vmem>>, vector<1x1x8x32xf32>
      %69 = vector.shape_cast %68 : vector<1x1x8x32xf32> to vector<8x32xf32>
      %70 = vector.shape_cast %64 : vector<8x32xf32> to vector<1x1x8x32xf32>
      tpu.vector_store %arg4[%c0_39, %67, %c0_40, %c0_41], %70 {strides = array<i32>} : memref<1x8x8x32xf32, #tpu.memory_space<vmem>>, vector<1x1x8x32xf32>,
      %c2_i32 = arith.constant 2 : i32
      %c0_42 = arith.constant 0 : index
      %71 = arith.index_cast %c2_i32 : i32 to index
      %c0_43 = arith.constant 0 : index
      %c0_44 = arith.constant 0 : index
      %72 = vector.load %arg2[%c0_42, %71, %c0_43, %c0_44] : memref<1x8x8x128xf32, #tpu.memory_space<vmem>>, vector<1x1x8x128xf32>
      %73 = vector.shape_cast %72 : vector<1x1x8x128xf32> to vector<8x128xf32>
      %c0_45 = arith.constant 0 : index
      %c0_46 = arith.constant 0 : index
      %74 = vector.load %arg5[%c0_45, %c0_46] : memref<8x32xf32, #tpu.memory_space<vmem>>, vector<8x32xf32>
      %c0_47 = arith.constant 0 : index
      %c0_48 = arith.constant 0 : index
      %c0_49 = arith.constant 0 : index
      %75 = vector.load %arg3[%c0_47, %c0_48, %c0_49] : memref<1x32x128xf32, #tpu.memory_space<vmem>>, vector<1x32x128xf32>
      %76 = vector.shape_cast %75 : vector<1x32x128xf32> to vector<32x128xf32>
      %cst_50 = arith.constant dense<0.000000e+00> : vector<8x128xf32>
      %77 = tpu.matmul %74, %76, %cst_50 {dimension_numbers = #tpu.dot_dimension_numbers<[1], [0], [0], [1], [0, 0, 1, 1], [], []>} : vector<8x32xf32>, vector<32x128xf32>, vector<8x128xf32> -> vector<8x128xf32>
      %78 = arith.addf %73, %77 : vector<8x128xf32>
      %79 = vector.extract_strided_slice %78 {offsets = [0, 0], sizes = [8, 96], strides = [1, 1]} : vector<8x128xf32> to vector<8x96xf32>
      %80 = arith.negf %79 : vector<8x96xf32>
      %81 = math.exp %80 : vector<8x96xf32>
      %cst_51 = arith.constant 1.000000e+00 : f32
      %82 = vector.broadcast %cst_51 : f32 to vector<8x96xf32>
      %83 = arith.addf %82, %81 : vector<8x96xf32>
      %84 = arith.divf %82, %83 : vector<8x96xf32>
      %85 = vector.extract_strided_slice %78 {offsets = [0, 96], sizes = [8, 32], strides = [1, 1]} : vector<8x128xf32> to vector<8x32xf32>
      %86 = math.tanh %85 : vector<8x32xf32>
      %87 = vector.extract_strided_slice %84 {offsets = [0, 32], sizes = [8, 32], strides = [1, 1]} : vector<8x96xf32> to vector<8x32xf32>
      %c0_52 = arith.constant 0 : index
      %c0_53 = arith.constant 0 : index
      %88 = vector.load %arg6[%c0_52, %c0_53] : memref<8x32xf32, #tpu.memory_space<vmem>>, vector<8x32xf32>
      %89 = arith.mulf %87, %88 : vector<8x32xf32>
      %90 = vector.extract_strided_slice %84 {offsets = [0, 0], sizes = [8, 32], strides = [1, 1]} : vector<8x96xf32> to vector<8x32xf32>
      %91 = arith.mulf %90, %86 : vector<8x32xf32>
      %92 = arith.addf %89, %91 : vector<8x32xf32>
      %93 = vector.extract_strided_slice %84 {offsets = [0, 64], sizes = [8, 32], strides = [1, 1]} : vector<8x96xf32> to vector<8x32xf32>
      %94 = math.tanh %92 : vector<8x32xf32>
      %95 = arith.mulf %93, %94 : vector<8x32xf32>
      %c0_54 = arith.constant 0 : index
      %c0_55 = arith.constant 0 : index
      %96 = vector.load %arg6[%c0_54, %c0_55] : memref<8x32xf32, #tpu.memory_space<vmem>>, vector<8x32xf32>
      tpu.vector_store %arg6[%c0_54, %c0_55], %92 {strides = array<i32>} : memref<8x32xf32, #tpu.memory_space<vmem>>, vector<8x32xf32>,
      %c0_56 = arith.constant 0 : index
      %c0_57 = arith.constant 0 : index
      %97 = vector.load %arg5[%c0_56, %c0_57] : memref<8x32xf32, #tpu.memory_space<vmem>>, vector<8x32xf32>
      tpu.vector_store %arg5[%c0_56, %c0_57], %95 {strides = array<i32>} : memref<8x32xf32, #tpu.memory_space<vmem>>, vector<8x32xf32>,
      %c0_58 = arith.constant 0 : index
      %98 = arith.index_cast %c2_i32 : i32 to index
      %c0_59 = arith.constant 0 : index
      %c0_60 = arith.constant 0 : index
      %99 = vector.load %arg4[%c0_58, %98, %c0_59, %c0_60] : memref<1x8x8x32xf32, #tpu.memory_space<vmem>>, vector<1x1x8x32xf32>
      %100 = vector.shape_cast %99 : vector<1x1x8x32xf32> to vector<8x32xf32>
      %101 = vector.shape_cast %95 : vector<8x32xf32> to vector<1x1x8x32xf32>
      tpu.vector_store %arg4[%c0_58, %98, %c0_59, %c0_60], %101 {strides = array<i32>} : memref<1x8x8x32xf32, #tpu.memory_space<vmem>>, vector<1x1x8x32xf32>,
      %c3_i32 = arith.constant 3 : i32
      %c0_61 = arith.constant 0 : index
      %102 = arith.index_cast %c3_i32 : i32 to index
      %c0_62 = arith.constant 0 : index
      %c0_63 = arith.constant 0 : index
      %103 = vector.load %arg2[%c0_61, %102, %c0_62, %c0_63] : memref<1x8x8x128xf32, #tpu.memory_space<vmem>>, vector<1x1x8x128xf32>
      %104 = vector.shape_cast %103 : vector<1x1x8x128xf32> to vector<8x128xf32>
      %c0_64 = arith.constant 0 : index
      %c0_65 = arith.constant 0 : index
      %105 = vector.load %arg5[%c0_64, %c0_65] : memref<8x32xf32, #tpu.memory_space<vmem>>, vector<8x32xf32>
      %c0_66 = arith.constant 0 : index
      %c0_67 = arith.constant 0 : index
      %c0_68 = arith.constant 0 : index
      %106 = vector.load %arg3[%c0_66, %c0_67, %c0_68] : memref<1x32x128xf32, #tpu.memory_space<vmem>>, vector<1x32x128xf32>
      %107 = vector.shape_cast %106 : vector<1x32x128xf32> to vector<32x128xf32>
      %cst_69 = arith.constant dense<0.000000e+00> : vector<8x128xf32>
      %108 = tpu.matmul %105, %107, %cst_69 {dimension_numbers = #tpu.dot_dimension_numbers<[1], [0], [0], [1], [0, 0, 1, 1], [], []>} : vector<8x32xf32>, vector<32x128xf32>, vector<8x128xf32> -> vector<8x128xf32>
      %109 = arith.addf %104, %108 : vector<8x128xf32>
      %110 = vector.extract_strided_slice %109 {offsets = [0, 0], sizes = [8, 96], strides = [1, 1]} : vector<8x128xf32> to vector<8x96xf32>
      %111 = arith.negf %110 : vector<8x96xf32>
      %112 = math.exp %111 : vector<8x96xf32>
      %cst_70 = arith.constant 1.000000e+00 : f32
      %113 = vector.broadcast %cst_70 : f32 to vector<8x96xf32>
      %114 = arith.addf %113, %112 : vector<8x96xf32>
      %115 = arith.divf %113, %114 : vector<8x96xf32>
      %116 = vector.extract_strided_slice %109 {offsets = [0, 96], sizes = [8, 32], strides = [1, 1]} : vector<8x128xf32> to vector<8x32xf32>
      %117 = math.tanh %116 : vector<8x32xf32>
      %118 = vector.extract_strided_slice %115 {offsets = [0, 32], sizes = [8, 32], strides = [1, 1]} : vector<8x96xf32> to vector<8x32xf32>
      %c0_71 = arith.constant 0 : index
      %c0_72 = arith.constant 0 : index
      %119 = vector.load %arg6[%c0_71, %c0_72] : memref<8x32xf32, #tpu.memory_space<vmem>>, vector<8x32xf32>
      %120 = arith.mulf %118, %119 : vector<8x32xf32>
      %121 = vector.extract_strided_slice %115 {offsets = [0, 0], sizes = [8, 32], strides = [1, 1]} : vector<8x96xf32> to vector<8x32xf32>
      %122 = arith.mulf %121, %117 : vector<8x32xf32>
      %123 = arith.addf %120, %122 : vector<8x32xf32>
      %124 = vector.extract_strided_slice %115 {offsets = [0, 64], sizes = [8, 32], strides = [1, 1]} : vector<8x96xf32> to vector<8x32xf32>
      %125 = math.tanh %123 : vector<8x32xf32>
      %126 = arith.mulf %124, %125 : vector<8x32xf32>
      %c0_73 = arith.constant 0 : index
      %c0_74 = arith.constant 0 : index
      %127 = vector.load %arg6[%c0_73, %c0_74] : memref<8x32xf32, #tpu.memory_space<vmem>>, vector<8x32xf32>
      tpu.vector_store %arg6[%c0_73, %c0_74], %123 {strides = array<i32>} : memref<8x32xf32, #tpu.memory_space<vmem>>, vector<8x32xf32>,
      %c0_75 = arith.constant 0 : index
      %c0_76 = arith.constant 0 : index
      %128 = vector.load %arg5[%c0_75, %c0_76] : memref<8x32xf32, #tpu.memory_space<vmem>>, vector<8x32xf32>
      tpu.vector_store %arg5[%c0_75, %c0_76], %126 {strides = array<i32>} : memref<8x32xf32, #tpu.memory_space<vmem>>, vector<8x32xf32>,
      %c0_77 = arith.constant 0 : index
      %129 = arith.index_cast %c3_i32 : i32 to index
      %c0_78 = arith.constant 0 : index
      %c0_79 = arith.constant 0 : index
      %130 = vector.load %arg4[%c0_77, %129, %c0_78, %c0_79] : memref<1x8x8x32xf32, #tpu.memory_space<vmem>>, vector<1x1x8x32xf32>
      %131 = vector.shape_cast %130 : vector<1x1x8x32xf32> to vector<8x32xf32>
      %132 = vector.shape_cast %126 : vector<8x32xf32> to vector<1x1x8x32xf32>
      tpu.vector_store %arg4[%c0_77, %129, %c0_78, %c0_79], %132 {strides = array<i32>} : memref<1x8x8x32xf32, #tpu.memory_space<vmem>>, vector<1x1x8x32xf32>,
      %c4_i32 = arith.constant 4 : i32
      %c0_80 = arith.constant 0 : index
      %133 = arith.index_cast %c4_i32 : i32 to index
      %c0_81 = arith.constant 0 : index
      %c0_82 = arith.constant 0 : index
      %134 = vector.load %arg2[%c0_80, %133, %c0_81, %c0_82] : memref<1x8x8x128xf32, #tpu.memory_space<vmem>>, vector<1x1x8x128xf32>
      %135 = vector.shape_cast %134 : vector<1x1x8x128xf32> to vector<8x128xf32>
      %c0_83 = arith.constant 0 : index
      %c0_84 = arith.constant 0 : index
      %136 = vector.load %arg5[%c0_83, %c0_84] : memref<8x32xf32, #tpu.memory_space<vmem>>, vector<8x32xf32>
      %c0_85 = arith.constant 0 : index
      %c0_86 = arith.constant 0 : index
      %c0_87 = arith.constant 0 : index
      %137 = vector.load %arg3[%c0_85, %c0_86, %c0_87] : memref<1x32x128xf32, #tpu.memory_space<vmem>>, vector<1x32x128xf32>
      %138 = vector.shape_cast %137 : vector<1x32x128xf32> to vector<32x128xf32>
      %cst_88 = arith.constant dense<0.000000e+00> : vector<8x128xf32>
      %139 = tpu.matmul %136, %138, %cst_88 {dimension_numbers = #tpu.dot_dimension_numbers<[1], [0], [0], [1], [0, 0, 1, 1], [], []>} : vector<8x32xf32>, vector<32x128xf32>, vector<8x128xf32> -> vector<8x128xf32>
      %140 = arith.addf %135, %139 : vector<8x128xf32>
      %141 = vector.extract_strided_slice %140 {offsets = [0, 0], sizes = [8, 96], strides = [1, 1]} : vector<8x128xf32> to vector<8x96xf32>
      %142 = arith.negf %141 : vector<8x96xf32>
      %143 = math.exp %142 : vector<8x96xf32>
      %cst_89 = arith.constant 1.000000e+00 : f32
      %144 = vector.broadcast %cst_89 : f32 to vector<8x96xf32>
      %145 = arith.addf %144, %143 : vector<8x96xf32>
      %146 = arith.divf %144, %145 : vector<8x96xf32>
      %147 = vector.extract_strided_slice %140 {offsets = [0, 96], sizes = [8, 32], strides = [1, 1]} : vector<8x128xf32> to vector<8x32xf32>
      %148 = math.tanh %147 : vector<8x32xf32>
      %149 = vector.extract_strided_slice %146 {offsets = [0, 32], sizes = [8, 32], strides = [1, 1]} : vector<8x96xf32> to vector<8x32xf32>
      %c0_90 = arith.constant 0 : index
      %c0_91 = arith.constant 0 : index
      %150 = vector.load %arg6[%c0_90, %c0_91] : memref<8x32xf32, #tpu.memory_space<vmem>>, vector<8x32xf32>
      %151 = arith.mulf %149, %150 : vector<8x32xf32>
      %152 = vector.extract_strided_slice %146 {offsets = [0, 0], sizes = [8, 32], strides = [1, 1]} : vector<8x96xf32> to vector<8x32xf32>
      %153 = arith.mulf %152, %148 : vector<8x32xf32>
      %154 = arith.addf %151, %153 : vector<8x32xf32>
      %155 = vector.extract_strided_slice %146 {offsets = [0, 64], sizes = [8, 32], strides = [1, 1]} : vector<8x96xf32> to vector<8x32xf32>
      %156 = math.tanh %154 : vector<8x32xf32>
      %157 = arith.mulf %155, %156 : vector<8x32xf32>
      %c0_92 = arith.constant 0 : index
      %c0_93 = arith.constant 0 : index
      %158 = vector.load %arg6[%c0_92, %c0_93] : memref<8x32xf32, #tpu.memory_space<vmem>>, vector<8x32xf32>
      tpu.vector_store %arg6[%c0_92, %c0_93], %154 {strides = array<i32>} : memref<8x32xf32, #tpu.memory_space<vmem>>, vector<8x32xf32>,
      %c0_94 = arith.constant 0 : index
      %c0_95 = arith.constant 0 : index
      %159 = vector.load %arg5[%c0_94, %c0_95] : memref<8x32xf32, #tpu.memory_space<vmem>>, vector<8x32xf32>
      tpu.vector_store %arg5[%c0_94, %c0_95], %157 {strides = array<i32>} : memref<8x32xf32, #tpu.memory_space<vmem>>, vector<8x32xf32>,
      %c0_96 = arith.constant 0 : index
      %160 = arith.index_cast %c4_i32 : i32 to index
      %c0_97 = arith.constant 0 : index
      %c0_98 = arith.constant 0 : index
      %161 = vector.load %arg4[%c0_96, %160, %c0_97, %c0_98] : memref<1x8x8x32xf32, #tpu.memory_space<vmem>>, vector<1x1x8x32xf32>
      %162 = vector.shape_cast %161 : vector<1x1x8x32xf32> to vector<8x32xf32>
      %163 = vector.shape_cast %157 : vector<8x32xf32> to vector<1x1x8x32xf32>
      tpu.vector_store %arg4[%c0_96, %160, %c0_97, %c0_98], %163 {strides = array<i32>} : memref<1x8x8x32xf32, #tpu.memory_space<vmem>>, vector<1x1x8x32xf32>,
      %c5_i32 = arith.constant 5 : i32
      %c0_99 = arith.constant 0 : index
      %164 = arith.index_cast %c5_i32 : i32 to index
      %c0_100 = arith.constant 0 : index
      %c0_101 = arith.constant 0 : index
      %165 = vector.load %arg2[%c0_99, %164, %c0_100, %c0_101] : memref<1x8x8x128xf32, #tpu.memory_space<vmem>>, vector<1x1x8x128xf32>
      %166 = vector.shape_cast %165 : vector<1x1x8x128xf32> to vector<8x128xf32>
      %c0_102 = arith.constant 0 : index
      %c0_103 = arith.constant 0 : index
      %167 = vector.load %arg5[%c0_102, %c0_103] : memref<8x32xf32, #tpu.memory_space<vmem>>, vector<8x32xf32>
      %c0_104 = arith.constant 0 : index
      %c0_105 = arith.constant 0 : index
      %c0_106 = arith.constant 0 : index
      %168 = vector.load %arg3[%c0_104, %c0_105, %c0_106] : memref<1x32x128xf32, #tpu.memory_space<vmem>>, vector<1x32x128xf32>
      %169 = vector.shape_cast %168 : vector<1x32x128xf32> to vector<32x128xf32>
      %cst_107 = arith.constant dense<0.000000e+00> : vector<8x128xf32>
      %170 = tpu.matmul %167, %169, %cst_107 {dimension_numbers = #tpu.dot_dimension_numbers<[1], [0], [0], [1], [0, 0, 1, 1], [], []>} : vector<8x32xf32>, vector<32x128xf32>, vector<8x128xf32> -> vector<8x128xf32>
      %171 = arith.addf %166, %170 : vector<8x128xf32>
      %172 = vector.extract_strided_slice %171 {offsets = [0, 0], sizes = [8, 96], strides = [1, 1]} : vector<8x128xf32> to vector<8x96xf32>
      %173 = arith.negf %172 : vector<8x96xf32>
      %174 = math.exp %173 : vector<8x96xf32>
      %cst_108 = arith.constant 1.000000e+00 : f32
      %175 = vector.broadcast %cst_108 : f32 to vector<8x96xf32>
      %176 = arith.addf %175, %174 : vector<8x96xf32>
      %177 = arith.divf %175, %176 : vector<8x96xf32>
      %178 = vector.extract_strided_slice %171 {offsets = [0, 96], sizes = [8, 32], strides = [1, 1]} : vector<8x128xf32> to vector<8x32xf32>
      %179 = math.tanh %178 : vector<8x32xf32>
      %180 = vector.extract_strided_slice %177 {offsets = [0, 32], sizes = [8, 32], strides = [1, 1]} : vector<8x96xf32> to vector<8x32xf32>
      %c0_109 = arith.constant 0 : index
      %c0_110 = arith.constant 0 : index
      %181 = vector.load %arg6[%c0_109, %c0_110] : memref<8x32xf32, #tpu.memory_space<vmem>>, vector<8x32xf32>
      %182 = arith.mulf %180, %181 : vector<8x32xf32>
      %183 = vector.extract_strided_slice %177 {offsets = [0, 0], sizes = [8, 32], strides = [1, 1]} : vector<8x96xf32> to vector<8x32xf32>
      %184 = arith.mulf %183, %179 : vector<8x32xf32>
      %185 = arith.addf %182, %184 : vector<8x32xf32>
      %186 = vector.extract_strided_slice %177 {offsets = [0, 64], sizes = [8, 32], strides = [1, 1]} : vector<8x96xf32> to vector<8x32xf32>
      %187 = math.tanh %185 : vector<8x32xf32>
      %188 = arith.mulf %186, %187 : vector<8x32xf32>
      %c0_111 = arith.constant 0 : index
      %c0_112 = arith.constant 0 : index
      %189 = vector.load %arg6[%c0_111, %c0_112] : memref<8x32xf32, #tpu.memory_space<vmem>>, vector<8x32xf32>
      tpu.vector_store %arg6[%c0_111, %c0_112], %185 {strides = array<i32>} : memref<8x32xf32, #tpu.memory_space<vmem>>, vector<8x32xf32>,
      %c0_113 = arith.constant 0 : index
      %c0_114 = arith.constant 0 : index
      %190 = vector.load %arg5[%c0_113, %c0_114] : memref<8x32xf32, #tpu.memory_space<vmem>>, vector<8x32xf32>
      tpu.vector_store %arg5[%c0_113, %c0_114], %188 {strides = array<i32>} : memref<8x32xf32, #tpu.memory_space<vmem>>, vector<8x32xf32>,
      %c0_115 = arith.constant 0 : index
      %191 = arith.index_cast %c5_i32 : i32 to index
      %c0_116 = arith.constant 0 : index
      %c0_117 = arith.constant 0 : index
      %192 = vector.load %arg4[%c0_115, %191, %c0_116, %c0_117] : memref<1x8x8x32xf32, #tpu.memory_space<vmem>>, vector<1x1x8x32xf32>
      %193 = vector.shape_cast %192 : vector<1x1x8x32xf32> to vector<8x32xf32>
      %194 = vector.shape_cast %188 : vector<8x32xf32> to vector<1x1x8x32xf32>
      tpu.vector_store %arg4[%c0_115, %191, %c0_116, %c0_117], %194 {strides = array<i32>} : memref<1x8x8x32xf32, #tpu.memory_space<vmem>>, vector<1x1x8x32xf32>,
      %c6_i32 = arith.constant 6 : i32
      %c0_118 = arith.constant 0 : index
      %195 = arith.index_cast %c6_i32 : i32 to index
      %c0_119 = arith.constant 0 : index
      %c0_120 = arith.constant 0 : index
      %196 = vector.load %arg2[%c0_118, %195, %c0_119, %c0_120] : memref<1x8x8x128xf32, #tpu.memory_space<vmem>>, vector<1x1x8x128xf32>
      %197 = vector.shape_cast %196 : vector<1x1x8x128xf32> to vector<8x128xf32>
      %c0_121 = arith.constant 0 : index
      %c0_122 = arith.constant 0 : index
      %198 = vector.load %arg5[%c0_121, %c0_122] : memref<8x32xf32, #tpu.memory_space<vmem>>, vector<8x32xf32>
      %c0_123 = arith.constant 0 : index
      %c0_124 = arith.constant 0 : index
      %c0_125 = arith.constant 0 : index
      %199 = vector.load %arg3[%c0_123, %c0_124, %c0_125] : memref<1x32x128xf32, #tpu.memory_space<vmem>>, vector<1x32x128xf32>
      %200 = vector.shape_cast %199 : vector<1x32x128xf32> to vector<32x128xf32>
      %cst_126 = arith.constant dense<0.000000e+00> : vector<8x128xf32>
      %201 = tpu.matmul %198, %200, %cst_126 {dimension_numbers = #tpu.dot_dimension_numbers<[1], [0], [0], [1], [0, 0, 1, 1], [], []>} : vector<8x32xf32>, vector<32x128xf32>, vector<8x128xf32> -> vector<8x128xf32>
      %202 = arith.addf %197, %201 : vector<8x128xf32>
      %203 = vector.extract_strided_slice %202 {offsets = [0, 0], sizes = [8, 96], strides = [1, 1]} : vector<8x128xf32> to vector<8x96xf32>
      %204 = arith.negf %203 : vector<8x96xf32>
      %205 = math.exp %204 : vector<8x96xf32>
      %cst_127 = arith.constant 1.000000e+00 : f32
      %206 = vector.broadcast %cst_127 : f32 to vector<8x96xf32>
      %207 = arith.addf %206, %205 : vector<8x96xf32>
      %208 = arith.divf %206, %207 : vector<8x96xf32>
      %209 = vector.extract_strided_slice %202 {offsets = [0, 96], sizes = [8, 32], strides = [1, 1]} : vector<8x128xf32> to vector<8x32xf32>
      %210 = math.tanh %209 : vector<8x32xf32>
      %211 = vector.extract_strided_slice %208 {offsets = [0, 32], sizes = [8, 32], strides = [1, 1]} : vector<8x96xf32> to vector<8x32xf32>
      %c0_128 = arith.constant 0 : index
      %c0_129 = arith.constant 0 : index
      %212 = vector.load %arg6[%c0_128, %c0_129] : memref<8x32xf32, #tpu.memory_space<vmem>>, vector<8x32xf32>
      %213 = arith.mulf %211, %212 : vector<8x32xf32>
      %214 = vector.extract_strided_slice %208 {offsets = [0, 0], sizes = [8, 32], strides = [1, 1]} : vector<8x96xf32> to vector<8x32xf32>
      %215 = arith.mulf %214, %210 : vector<8x32xf32>
      %216 = arith.addf %213, %215 : vector<8x32xf32>
      %217 = vector.extract_strided_slice %208 {offsets = [0, 64], sizes = [8, 32], strides = [1, 1]} : vector<8x96xf32> to vector<8x32xf32>
      %218 = math.tanh %216 : vector<8x32xf32>
      %219 = arith.mulf %217, %218 : vector<8x32xf32>
      %c0_130 = arith.constant 0 : index
      %c0_131 = arith.constant 0 : index
      %220 = vector.load %arg6[%c0_130, %c0_131] : memref<8x32xf32, #tpu.memory_space<vmem>>, vector<8x32xf32>
      tpu.vector_store %arg6[%c0_130, %c0_131], %216 {strides = array<i32>} : memref<8x32xf32, #tpu.memory_space<vmem>>, vector<8x32xf32>,
      %c0_132 = arith.constant 0 : index
      %c0_133 = arith.constant 0 : index
      %221 = vector.load %arg5[%c0_132, %c0_133] : memref<8x32xf32, #tpu.memory_space<vmem>>, vector<8x32xf32>
      tpu.vector_store %arg5[%c0_132, %c0_133], %219 {strides = array<i32>} : memref<8x32xf32, #tpu.memory_space<vmem>>, vector<8x32xf32>,
      %c0_134 = arith.constant 0 : index
      %222 = arith.index_cast %c6_i32 : i32 to index
      %c0_135 = arith.constant 0 : index
      %c0_136 = arith.constant 0 : index
      %223 = vector.load %arg4[%c0_134, %222, %c0_135, %c0_136] : memref<1x8x8x32xf32, #tpu.memory_space<vmem>>, vector<1x1x8x32xf32>
      %224 = vector.shape_cast %223 : vector<1x1x8x32xf32> to vector<8x32xf32>
      %225 = vector.shape_cast %219 : vector<8x32xf32> to vector<1x1x8x32xf32>
      tpu.vector_store %arg4[%c0_134, %222, %c0_135, %c0_136], %225 {strides = array<i32>} : memref<1x8x8x32xf32, #tpu.memory_space<vmem>>, vector<1x1x8x32xf32>,
      %c7_i32 = arith.constant 7 : i32
      %c0_137 = arith.constant 0 : index
      %226 = arith.index_cast %c7_i32 : i32 to index
      %c0_138 = arith.constant 0 : index
      %c0_139 = arith.constant 0 : index
      %227 = vector.load %arg2[%c0_137, %226, %c0_138, %c0_139] : memref<1x8x8x128xf32, #tpu.memory_space<vmem>>, vector<1x1x8x128xf32>
      %228 = vector.shape_cast %227 : vector<1x1x8x128xf32> to vector<8x128xf32>
      %c0_140 = arith.constant 0 : index
      %c0_141 = arith.constant 0 : index
      %229 = vector.load %arg5[%c0_140, %c0_141] : memref<8x32xf32, #tpu.memory_space<vmem>>, vector<8x32xf32>
      %c0_142 = arith.constant 0 : index
      %c0_143 = arith.constant 0 : index
      %c0_144 = arith.constant 0 : index
      %230 = vector.load %arg3[%c0_142, %c0_143, %c0_144] : memref<1x32x128xf32, #tpu.memory_space<vmem>>, vector<1x32x128xf32>
      %231 = vector.shape_cast %230 : vector<1x32x128xf32> to vector<32x128xf32>
      %cst_145 = arith.constant dense<0.000000e+00> : vector<8x128xf32>
      %232 = tpu.matmul %229, %231, %cst_145 {dimension_numbers = #tpu.dot_dimension_numbers<[1], [0], [0], [1], [0, 0, 1, 1], [], []>} : vector<8x32xf32>, vector<32x128xf32>, vector<8x128xf32> -> vector<8x128xf32>
      %233 = arith.addf %228, %232 : vector<8x128xf32>
      %234 = vector.extract_strided_slice %233 {offsets = [0, 0], sizes = [8, 96], strides = [1, 1]} : vector<8x128xf32> to vector<8x96xf32>
      %235 = arith.negf %234 : vector<8x96xf32>
      %236 = math.exp %235 : vector<8x96xf32>
      %cst_146 = arith.constant 1.000000e+00 : f32
      %237 = vector.broadcast %cst_146 : f32 to vector<8x96xf32>
      %238 = arith.addf %237, %236 : vector<8x96xf32>
      %239 = arith.divf %237, %238 : vector<8x96xf32>
      %240 = vector.extract_strided_slice %233 {offsets = [0, 96], sizes = [8, 32], strides = [1, 1]} : vector<8x128xf32> to vector<8x32xf32>
      %241 = math.tanh %240 : vector<8x32xf32>
      %242 = vector.extract_strided_slice %239 {offsets = [0, 32], sizes = [8, 32], strides = [1, 1]} : vector<8x96xf32> to vector<8x32xf32>
      %c0_147 = arith.constant 0 : index
      %c0_148 = arith.constant 0 : index
      %243 = vector.load %arg6[%c0_147, %c0_148] : memref<8x32xf32, #tpu.memory_space<vmem>>, vector<8x32xf32>
      %244 = arith.mulf %242, %243 : vector<8x32xf32>
      %245 = vector.extract_strided_slice %239 {offsets = [0, 0], sizes = [8, 32], strides = [1, 1]} : vector<8x96xf32> to vector<8x32xf32>
      %246 = arith.mulf %245, %241 : vector<8x32xf32>
      %247 = arith.addf %244, %246 : vector<8x32xf32>
      %248 = vector.extract_strided_slice %239 {offsets = [0, 64], sizes = [8, 32], strides = [1, 1]} : vector<8x96xf32> to vector<8x32xf32>
      %249 = math.tanh %247 : vector<8x32xf32>
      %250 = arith.mulf %248, %249 : vector<8x32xf32>
      %c0_149 = arith.constant 0 : index
      %c0_150 = arith.constant 0 : index
      %251 = vector.load %arg6[%c0_149, %c0_150] : memref<8x32xf32, #tpu.memory_space<vmem>>, vector<8x32xf32>
      tpu.vector_store %arg6[%c0_149, %c0_150], %247 {strides = array<i32>} : memref<8x32xf32, #tpu.memory_space<vmem>>, vector<8x32xf32>,
      %c0_151 = arith.constant 0 : index
      %c0_152 = arith.constant 0 : index
      %252 = vector.load %arg5[%c0_151, %c0_152] : memref<8x32xf32, #tpu.memory_space<vmem>>, vector<8x32xf32>
      tpu.vector_store %arg5[%c0_151, %c0_152], %250 {strides = array<i32>} : memref<8x32xf32, #tpu.memory_space<vmem>>, vector<8x32xf32>,
      %c0_153 = arith.constant 0 : index
      %253 = arith.index_cast %c7_i32 : i32 to index
      %c0_154 = arith.constant 0 : index
      %c0_155 = arith.constant 0 : index
      %254 = vector.load %arg4[%c0_153, %253, %c0_154, %c0_155] : memref<1x8x8x32xf32, #tpu.memory_space<vmem>>, vector<1x1x8x32xf32>
      %255 = vector.shape_cast %254 : vector<1x1x8x32xf32> to vector<8x32xf32>
      %256 = vector.shape_cast %250 : vector<8x32xf32> to vector<1x1x8x32xf32>
      tpu.vector_store %arg4[%c0_153, %253, %c0_154, %c0_155], %256 {strides = array<i32>} : memref<1x8x8x32xf32, #tpu.memory_space<vmem>>, vector<1x1x8x32xf32>,
      %c8_i32 = arith.constant 8 : i32
    } else {
    }
    %c0_i32_3 = arith.constant 0 : i32
    %6 = arith.cmpi ne, %arg0, %c0_i32_3 : i32
    %7 = arith.extui %6 : i1 to i32
    %c0_i32_4 = arith.constant 0 : i32
    %8 = arith.cmpi ne, %7, %c0_i32_4 : i32
    scf.if %8 {
      %c0_i32_5 = arith.constant 0 : i32
      %c7_i32 = arith.constant 7 : i32
      %9 = arith.subi %c7_i32, %c0_i32_5 : i32
      %c0 = arith.constant 0 : index
      %10 = arith.index_cast %9 : i32 to index
      %c0_6 = arith.constant 0 : index
      %c0_7 = arith.constant 0 : index
      %11 = vector.load %arg2[%c0, %10, %c0_6, %c0_7] : memref<1x8x8x128xf32, #tpu.memory_space<vmem>>, vector<1x1x8x128xf32>
      %12 = vector.shape_cast %11 : vector<1x1x8x128xf32> to vector<8x128xf32>
      %c0_8 = arith.constant 0 : index
      %c0_9 = arith.constant 0 : index
      %13 = vector.load %arg5[%c0_8, %c0_9] : memref<8x32xf32, #tpu.memory_space<vmem>>, vector<8x32xf32>
      %c0_10 = arith.constant 0 : index
      %c0_11 = arith.constant 0 : index
      %c0_12 = arith.constant 0 : index
      %14 = vector.load %arg3[%c0_10, %c0_11, %c0_12] : memref<1x32x128xf32, #tpu.memory_space<vmem>>, vector<1x32x128xf32>
      %15 = vector.shape_cast %14 : vector<1x32x128xf32> to vector<32x128xf32>
      %cst = arith.constant dense<0.000000e+00> : vector<8x128xf32>
      %16 = tpu.matmul %13, %15, %cst {dimension_numbers = #tpu.dot_dimension_numbers<[1], [0], [0], [1], [0, 0, 1, 1], [], []>} : vector<8x32xf32>, vector<32x128xf32>, vector<8x128xf32> -> vector<8x128xf32>
      %17 = arith.addf %12, %16 : vector<8x128xf32>
      %18 = vector.extract_strided_slice %17 {offsets = [0, 0], sizes = [8, 96], strides = [1, 1]} : vector<8x128xf32> to vector<8x96xf32>
      %19 = arith.negf %18 : vector<8x96xf32>
      %20 = math.exp %19 : vector<8x96xf32>
      %cst_13 = arith.constant 1.000000e+00 : f32
      %21 = vector.broadcast %cst_13 : f32 to vector<8x96xf32>
      %22 = arith.addf %21, %20 : vector<8x96xf32>
      %23 = arith.divf %21, %22 : vector<8x96xf32>
      %24 = vector.extract_strided_slice %17 {offsets = [0, 96], sizes = [8, 32], strides = [1, 1]} : vector<8x128xf32> to vector<8x32xf32>
      %25 = math.tanh %24 : vector<8x32xf32>
      %26 = vector.extract_strided_slice %23 {offsets = [0, 32], sizes = [8, 32], strides = [1, 1]} : vector<8x96xf32> to vector<8x32xf32>
      %c0_14 = arith.constant 0 : index
      %c0_15 = arith.constant 0 : index
      %27 = vector.load %arg6[%c0_14, %c0_15] : memref<8x32xf32, #tpu.memory_space<vmem>>, vector<8x32xf32>
      %28 = arith.mulf %26, %27 : vector<8x32xf32>
      %29 = vector.extract_strided_slice %23 {offsets = [0, 0], sizes = [8, 32], strides = [1, 1]} : vector<8x96xf32> to vector<8x32xf32>
      %30 = arith.mulf %29, %25 : vector<8x32xf32>
      %31 = arith.addf %28, %30 : vector<8x32xf32>
      %32 = vector.extract_strided_slice %23 {offsets = [0, 64], sizes = [8, 32], strides = [1, 1]} : vector<8x96xf32> to vector<8x32xf32>
      %33 = math.tanh %31 : vector<8x32xf32>
      %34 = arith.mulf %32, %33 : vector<8x32xf32>
      %c0_16 = arith.constant 0 : index
      %c0_17 = arith.constant 0 : index
      %35 = vector.load %arg6[%c0_16, %c0_17] : memref<8x32xf32, #tpu.memory_space<vmem>>, vector<8x32xf32>
      tpu.vector_store %arg6[%c0_16, %c0_17], %31 {strides = array<i32>} : memref<8x32xf32, #tpu.memory_space<vmem>>, vector<8x32xf32>,
      %c0_18 = arith.constant 0 : index
      %c0_19 = arith.constant 0 : index
      %36 = vector.load %arg5[%c0_18, %c0_19] : memref<8x32xf32, #tpu.memory_space<vmem>>, vector<8x32xf32>
      tpu.vector_store %arg5[%c0_18, %c0_19], %34 {strides = array<i32>} : memref<8x32xf32, #tpu.memory_space<vmem>>, vector<8x32xf32>,
      %c0_20 = arith.constant 0 : index
      %37 = arith.index_cast %9 : i32 to index
      %c0_21 = arith.constant 0 : index
      %c0_22 = arith.constant 0 : index
      %38 = vector.load %arg4[%c0_20, %37, %c0_21, %c0_22] : memref<1x8x8x32xf32, #tpu.memory_space<vmem>>, vector<1x1x8x32xf32>
      %39 = vector.shape_cast %38 : vector<1x1x8x32xf32> to vector<8x32xf32>
      %40 = vector.shape_cast %34 : vector<8x32xf32> to vector<1x1x8x32xf32>
      tpu.vector_store %arg4[%c0_20, %37, %c0_21, %c0_22], %40 {strides = array<i32>} : memref<1x8x8x32xf32, #tpu.memory_space<vmem>>, vector<1x1x8x32xf32>,
      %c1_i32 = arith.constant 1 : i32
      %c7_i32_23 = arith.constant 7 : i32
      %41 = arith.subi %c7_i32_23, %c1_i32 : i32
      %c0_24 = arith.constant 0 : index
      %42 = arith.index_cast %41 : i32 to index
      %c0_25 = arith.constant 0 : index
      %c0_26 = arith.constant 0 : index
      %43 = vector.load %arg2[%c0_24, %42, %c0_25, %c0_26] : memref<1x8x8x128xf32, #tpu.memory_space<vmem>>, vector<1x1x8x128xf32>
      %44 = vector.shape_cast %43 : vector<1x1x8x128xf32> to vector<8x128xf32>
      %c0_27 = arith.constant 0 : index
      %c0_28 = arith.constant 0 : index
      %45 = vector.load %arg5[%c0_27, %c0_28] : memref<8x32xf32, #tpu.memory_space<vmem>>, vector<8x32xf32>
      %c0_29 = arith.constant 0 : index
      %c0_30 = arith.constant 0 : index
      %c0_31 = arith.constant 0 : index
      %46 = vector.load %arg3[%c0_29, %c0_30, %c0_31] : memref<1x32x128xf32, #tpu.memory_space<vmem>>, vector<1x32x128xf32>
      %47 = vector.shape_cast %46 : vector<1x32x128xf32> to vector<32x128xf32>
      %cst_32 = arith.constant dense<0.000000e+00> : vector<8x128xf32>
      %48 = tpu.matmul %45, %47, %cst_32 {dimension_numbers = #tpu.dot_dimension_numbers<[1], [0], [0], [1], [0, 0, 1, 1], [], []>} : vector<8x32xf32>, vector<32x128xf32>, vector<8x128xf32> -> vector<8x128xf32>
      %49 = arith.addf %44, %48 : vector<8x128xf32>
      %50 = vector.extract_strided_slice %49 {offsets = [0, 0], sizes = [8, 96], strides = [1, 1]} : vector<8x128xf32> to vector<8x96xf32>
      %51 = arith.negf %50 : vector<8x96xf32>
      %52 = math.exp %51 : vector<8x96xf32>
      %cst_33 = arith.constant 1.000000e+00 : f32
      %53 = vector.broadcast %cst_33 : f32 to vector<8x96xf32>
      %54 = arith.addf %53, %52 : vector<8x96xf32>
      %55 = arith.divf %53, %54 : vector<8x96xf32>
      %56 = vector.extract_strided_slice %49 {offsets = [0, 96], sizes = [8, 32], strides = [1, 1]} : vector<8x128xf32> to vector<8x32xf32>
      %57 = math.tanh %56 : vector<8x32xf32>
      %58 = vector.extract_strided_slice %55 {offsets = [0, 32], sizes = [8, 32], strides = [1, 1]} : vector<8x96xf32> to vector<8x32xf32>
      %c0_34 = arith.constant 0 : index
      %c0_35 = arith.constant 0 : index
      %59 = vector.load %arg6[%c0_34, %c0_35] : memref<8x32xf32, #tpu.memory_space<vmem>>, vector<8x32xf32>
      %60 = arith.mulf %58, %59 : vector<8x32xf32>
      %61 = vector.extract_strided_slice %55 {offsets = [0, 0], sizes = [8, 32], strides = [1, 1]} : vector<8x96xf32> to vector<8x32xf32>
      %62 = arith.mulf %61, %57 : vector<8x32xf32>
      %63 = arith.addf %60, %62 : vector<8x32xf32>
      %64 = vector.extract_strided_slice %55 {offsets = [0, 64], sizes = [8, 32], strides = [1, 1]} : vector<8x96xf32> to vector<8x32xf32>
      %65 = math.tanh %63 : vector<8x32xf32>
      %66 = arith.mulf %64, %65 : vector<8x32xf32>
      %c0_36 = arith.constant 0 : index
      %c0_37 = arith.constant 0 : index
      %67 = vector.load %arg6[%c0_36, %c0_37] : memref<8x32xf32, #tpu.memory_space<vmem>>, vector<8x32xf32>
      tpu.vector_store %arg6[%c0_36, %c0_37], %63 {strides = array<i32>} : memref<8x32xf32, #tpu.memory_space<vmem>>, vector<8x32xf32>,
      %c0_38 = arith.constant 0 : index
      %c0_39 = arith.constant 0 : index
      %68 = vector.load %arg5[%c0_38, %c0_39] : memref<8x32xf32, #tpu.memory_space<vmem>>, vector<8x32xf32>
      tpu.vector_store %arg5[%c0_38, %c0_39], %66 {strides = array<i32>} : memref<8x32xf32, #tpu.memory_space<vmem>>, vector<8x32xf32>,
      %c0_40 = arith.constant 0 : index
      %69 = arith.index_cast %41 : i32 to index
      %c0_41 = arith.constant 0 : index
      %c0_42 = arith.constant 0 : index
      %70 = vector.load %arg4[%c0_40, %69, %c0_41, %c0_42] : memref<1x8x8x32xf32, #tpu.memory_space<vmem>>, vector<1x1x8x32xf32>
      %71 = vector.shape_cast %70 : vector<1x1x8x32xf32> to vector<8x32xf32>
      %72 = vector.shape_cast %66 : vector<8x32xf32> to vector<1x1x8x32xf32>
      tpu.vector_store %arg4[%c0_40, %69, %c0_41, %c0_42], %72 {strides = array<i32>} : memref<1x8x8x32xf32, #tpu.memory_space<vmem>>, vector<1x1x8x32xf32>,
      %c2_i32 = arith.constant 2 : i32
      %c7_i32_43 = arith.constant 7 : i32
      %73 = arith.subi %c7_i32_43, %c2_i32 : i32
      %c0_44 = arith.constant 0 : index
      %74 = arith.index_cast %73 : i32 to index
      %c0_45 = arith.constant 0 : index
      %c0_46 = arith.constant 0 : index
      %75 = vector.load %arg2[%c0_44, %74, %c0_45, %c0_46] : memref<1x8x8x128xf32, #tpu.memory_space<vmem>>, vector<1x1x8x128xf32>
      %76 = vector.shape_cast %75 : vector<1x1x8x128xf32> to vector<8x128xf32>
      %c0_47 = arith.constant 0 : index
      %c0_48 = arith.constant 0 : index
      %77 = vector.load %arg5[%c0_47, %c0_48] : memref<8x32xf32, #tpu.memory_space<vmem>>, vector<8x32xf32>
      %c0_49 = arith.constant 0 : index
      %c0_50 = arith.constant 0 : index
      %c0_51 = arith.constant 0 : index
      %78 = vector.load %arg3[%c0_49, %c0_50, %c0_51] : memref<1x32x128xf32, #tpu.memory_space<vmem>>, vector<1x32x128xf32>
      %79 = vector.shape_cast %78 : vector<1x32x128xf32> to vector<32x128xf32>
      %cst_52 = arith.constant dense<0.000000e+00> : vector<8x128xf32>
      %80 = tpu.matmul %77, %79, %cst_52 {dimension_numbers = #tpu.dot_dimension_numbers<[1], [0], [0], [1], [0, 0, 1, 1], [], []>} : vector<8x32xf32>, vector<32x128xf32>, vector<8x128xf32> -> vector<8x128xf32>
      %81 = arith.addf %76, %80 : vector<8x128xf32>
      %82 = vector.extract_strided_slice %81 {offsets = [0, 0], sizes = [8, 96], strides = [1, 1]} : vector<8x128xf32> to vector<8x96xf32>
      %83 = arith.negf %82 : vector<8x96xf32>
      %84 = math.exp %83 : vector<8x96xf32>
      %cst_53 = arith.constant 1.000000e+00 : f32
      %85 = vector.broadcast %cst_53 : f32 to vector<8x96xf32>
      %86 = arith.addf %85, %84 : vector<8x96xf32>
      %87 = arith.divf %85, %86 : vector<8x96xf32>
      %88 = vector.extract_strided_slice %81 {offsets = [0, 96], sizes = [8, 32], strides = [1, 1]} : vector<8x128xf32> to vector<8x32xf32>
      %89 = math.tanh %88 : vector<8x32xf32>
      %90 = vector.extract_strided_slice %87 {offsets = [0, 32], sizes = [8, 32], strides = [1, 1]} : vector<8x96xf32> to vector<8x32xf32>
      %c0_54 = arith.constant 0 : index
      %c0_55 = arith.constant 0 : index
      %91 = vector.load %arg6[%c0_54, %c0_55] : memref<8x32xf32, #tpu.memory_space<vmem>>, vector<8x32xf32>
      %92 = arith.mulf %90, %91 : vector<8x32xf32>
      %93 = vector.extract_strided_slice %87 {offsets = [0, 0], sizes = [8, 32], strides = [1, 1]} : vector<8x96xf32> to vector<8x32xf32>
      %94 = arith.mulf %93, %89 : vector<8x32xf32>
      %95 = arith.addf %92, %94 : vector<8x32xf32>
      %96 = vector.extract_strided_slice %87 {offsets = [0, 64], sizes = [8, 32], strides = [1, 1]} : vector<8x96xf32> to vector<8x32xf32>
      %97 = math.tanh %95 : vector<8x32xf32>
      %98 = arith.mulf %96, %97 : vector<8x32xf32>
      %c0_56 = arith.constant 0 : index
      %c0_57 = arith.constant 0 : index
      %99 = vector.load %arg6[%c0_56, %c0_57] : memref<8x32xf32, #tpu.memory_space<vmem>>, vector<8x32xf32>
      tpu.vector_store %arg6[%c0_56, %c0_57], %95 {strides = array<i32>} : memref<8x32xf32, #tpu.memory_space<vmem>>, vector<8x32xf32>,
      %c0_58 = arith.constant 0 : index
      %c0_59 = arith.constant 0 : index
      %100 = vector.load %arg5[%c0_58, %c0_59] : memref<8x32xf32, #tpu.memory_space<vmem>>, vector<8x32xf32>
      tpu.vector_store %arg5[%c0_58, %c0_59], %98 {strides = array<i32>} : memref<8x32xf32, #tpu.memory_space<vmem>>, vector<8x32xf32>,
      %c0_60 = arith.constant 0 : index
      %101 = arith.index_cast %73 : i32 to index
      %c0_61 = arith.constant 0 : index
      %c0_62 = arith.constant 0 : index
      %102 = vector.load %arg4[%c0_60, %101, %c0_61, %c0_62] : memref<1x8x8x32xf32, #tpu.memory_space<vmem>>, vector<1x1x8x32xf32>
      %103 = vector.shape_cast %102 : vector<1x1x8x32xf32> to vector<8x32xf32>
      %104 = vector.shape_cast %98 : vector<8x32xf32> to vector<1x1x8x32xf32>
      tpu.vector_store %arg4[%c0_60, %101, %c0_61, %c0_62], %104 {strides = array<i32>} : memref<1x8x8x32xf32, #tpu.memory_space<vmem>>, vector<1x1x8x32xf32>,
      %c3_i32 = arith.constant 3 : i32
      %c7_i32_63 = arith.constant 7 : i32
      %105 = arith.subi %c7_i32_63, %c3_i32 : i32
      %c0_64 = arith.constant 0 : index
      %106 = arith.index_cast %105 : i32 to index
      %c0_65 = arith.constant 0 : index
      %c0_66 = arith.constant 0 : index
      %107 = vector.load %arg2[%c0_64, %106, %c0_65, %c0_66] : memref<1x8x8x128xf32, #tpu.memory_space<vmem>>, vector<1x1x8x128xf32>
      %108 = vector.shape_cast %107 : vector<1x1x8x128xf32> to vector<8x128xf32>
      %c0_67 = arith.constant 0 : index
      %c0_68 = arith.constant 0 : index
      %109 = vector.load %arg5[%c0_67, %c0_68] : memref<8x32xf32, #tpu.memory_space<vmem>>, vector<8x32xf32>
      %c0_69 = arith.constant 0 : index
      %c0_70 = arith.constant 0 : index
      %c0_71 = arith.constant 0 : index
      %110 = vector.load %arg3[%c0_69, %c0_70, %c0_71] : memref<1x32x128xf32, #tpu.memory_space<vmem>>, vector<1x32x128xf32>
      %111 = vector.shape_cast %110 : vector<1x32x128xf32> to vector<32x128xf32>
      %cst_72 = arith.constant dense<0.000000e+00> : vector<8x128xf32>
      %112 = tpu.matmul %109, %111, %cst_72 {dimension_numbers = #tpu.dot_dimension_numbers<[1], [0], [0], [1], [0, 0, 1, 1], [], []>} : vector<8x32xf32>, vector<32x128xf32>, vector<8x128xf32> -> vector<8x128xf32>
      %113 = arith.addf %108, %112 : vector<8x128xf32>
      %114 = vector.extract_strided_slice %113 {offsets = [0, 0], sizes = [8, 96], strides = [1, 1]} : vector<8x128xf32> to vector<8x96xf32>
      %115 = arith.negf %114 : vector<8x96xf32>
      %116 = math.exp %115 : vector<8x96xf32>
      %cst_73 = arith.constant 1.000000e+00 : f32
      %117 = vector.broadcast %cst_73 : f32 to vector<8x96xf32>
      %118 = arith.addf %117, %116 : vector<8x96xf32>
      %119 = arith.divf %117, %118 : vector<8x96xf32>
      %120 = vector.extract_strided_slice %113 {offsets = [0, 96], sizes = [8, 32], strides = [1, 1]} : vector<8x128xf32> to vector<8x32xf32>
      %121 = math.tanh %120 : vector<8x32xf32>
      %122 = vector.extract_strided_slice %119 {offsets = [0, 32], sizes = [8, 32], strides = [1, 1]} : vector<8x96xf32> to vector<8x32xf32>
      %c0_74 = arith.constant 0 : index
      %c0_75 = arith.constant 0 : index
      %123 = vector.load %arg6[%c0_74, %c0_75] : memref<8x32xf32, #tpu.memory_space<vmem>>, vector<8x32xf32>
      %124 = arith.mulf %122, %123 : vector<8x32xf32>
      %125 = vector.extract_strided_slice %119 {offsets = [0, 0], sizes = [8, 32], strides = [1, 1]} : vector<8x96xf32> to vector<8x32xf32>
      %126 = arith.mulf %125, %121 : vector<8x32xf32>
      %127 = arith.addf %124, %126 : vector<8x32xf32>
      %128 = vector.extract_strided_slice %119 {offsets = [0, 64], sizes = [8, 32], strides = [1, 1]} : vector<8x96xf32> to vector<8x32xf32>
      %129 = math.tanh %127 : vector<8x32xf32>
      %130 = arith.mulf %128, %129 : vector<8x32xf32>
      %c0_76 = arith.constant 0 : index
      %c0_77 = arith.constant 0 : index
      %131 = vector.load %arg6[%c0_76, %c0_77] : memref<8x32xf32, #tpu.memory_space<vmem>>, vector<8x32xf32>
      tpu.vector_store %arg6[%c0_76, %c0_77], %127 {strides = array<i32>} : memref<8x32xf32, #tpu.memory_space<vmem>>, vector<8x32xf32>,
      %c0_78 = arith.constant 0 : index
      %c0_79 = arith.constant 0 : index
      %132 = vector.load %arg5[%c0_78, %c0_79] : memref<8x32xf32, #tpu.memory_space<vmem>>, vector<8x32xf32>
      tpu.vector_store %arg5[%c0_78, %c0_79], %130 {strides = array<i32>} : memref<8x32xf32, #tpu.memory_space<vmem>>, vector<8x32xf32>,
      %c0_80 = arith.constant 0 : index
      %133 = arith.index_cast %105 : i32 to index
      %c0_81 = arith.constant 0 : index
      %c0_82 = arith.constant 0 : index
      %134 = vector.load %arg4[%c0_80, %133, %c0_81, %c0_82] : memref<1x8x8x32xf32, #tpu.memory_space<vmem>>, vector<1x1x8x32xf32>
      %135 = vector.shape_cast %134 : vector<1x1x8x32xf32> to vector<8x32xf32>
      %136 = vector.shape_cast %130 : vector<8x32xf32> to vector<1x1x8x32xf32>
      tpu.vector_store %arg4[%c0_80, %133, %c0_81, %c0_82], %136 {strides = array<i32>} : memref<1x8x8x32xf32, #tpu.memory_space<vmem>>, vector<1x1x8x32xf32>,
      %c4_i32 = arith.constant 4 : i32
      %c7_i32_83 = arith.constant 7 : i32
      %137 = arith.subi %c7_i32_83, %c4_i32 : i32
      %c0_84 = arith.constant 0 : index
      %138 = arith.index_cast %137 : i32 to index
      %c0_85 = arith.constant 0 : index
      %c0_86 = arith.constant 0 : index
      %139 = vector.load %arg2[%c0_84, %138, %c0_85, %c0_86] : memref<1x8x8x128xf32, #tpu.memory_space<vmem>>, vector<1x1x8x128xf32>
      %140 = vector.shape_cast %139 : vector<1x1x8x128xf32> to vector<8x128xf32>
      %c0_87 = arith.constant 0 : index
      %c0_88 = arith.constant 0 : index
      %141 = vector.load %arg5[%c0_87, %c0_88] : memref<8x32xf32, #tpu.memory_space<vmem>>, vector<8x32xf32>
      %c0_89 = arith.constant 0 : index
      %c0_90 = arith.constant 0 : index
      %c0_91 = arith.constant 0 : index
      %142 = vector.load %arg3[%c0_89, %c0_90, %c0_91] : memref<1x32x128xf32, #tpu.memory_space<vmem>>, vector<1x32x128xf32>
      %143 = vector.shape_cast %142 : vector<1x32x128xf32> to vector<32x128xf32>
      %cst_92 = arith.constant dense<0.000000e+00> : vector<8x128xf32>
      %144 = tpu.matmul %141, %143, %cst_92 {dimension_numbers = #tpu.dot_dimension_numbers<[1], [0], [0], [1], [0, 0, 1, 1], [], []>} : vector<8x32xf32>, vector<32x128xf32>, vector<8x128xf32> -> vector<8x128xf32>
      %145 = arith.addf %140, %144 : vector<8x128xf32>
      %146 = vector.extract_strided_slice %145 {offsets = [0, 0], sizes = [8, 96], strides = [1, 1]} : vector<8x128xf32> to vector<8x96xf32>
      %147 = arith.negf %146 : vector<8x96xf32>
      %148 = math.exp %147 : vector<8x96xf32>
      %cst_93 = arith.constant 1.000000e+00 : f32
      %149 = vector.broadcast %cst_93 : f32 to vector<8x96xf32>
      %150 = arith.addf %149, %148 : vector<8x96xf32>
      %151 = arith.divf %149, %150 : vector<8x96xf32>
      %152 = vector.extract_strided_slice %145 {offsets = [0, 96], sizes = [8, 32], strides = [1, 1]} : vector<8x128xf32> to vector<8x32xf32>
      %153 = math.tanh %152 : vector<8x32xf32>
      %154 = vector.extract_strided_slice %151 {offsets = [0, 32], sizes = [8, 32], strides = [1, 1]} : vector<8x96xf32> to vector<8x32xf32>
      %c0_94 = arith.constant 0 : index
      %c0_95 = arith.constant 0 : index
      %155 = vector.load %arg6[%c0_94, %c0_95] : memref<8x32xf32, #tpu.memory_space<vmem>>, vector<8x32xf32>
      %156 = arith.mulf %154, %155 : vector<8x32xf32>
      %157 = vector.extract_strided_slice %151 {offsets = [0, 0], sizes = [8, 32], strides = [1, 1]} : vector<8x96xf32> to vector<8x32xf32>
      %158 = arith.mulf %157, %153 : vector<8x32xf32>
      %159 = arith.addf %156, %158 : vector<8x32xf32>
      %160 = vector.extract_strided_slice %151 {offsets = [0, 64], sizes = [8, 32], strides = [1, 1]} : vector<8x96xf32> to vector<8x32xf32>
      %161 = math.tanh %159 : vector<8x32xf32>
      %162 = arith.mulf %160, %161 : vector<8x32xf32>
      %c0_96 = arith.constant 0 : index
      %c0_97 = arith.constant 0 : index
      %163 = vector.load %arg6[%c0_96, %c0_97] : memref<8x32xf32, #tpu.memory_space<vmem>>, vector<8x32xf32>
      tpu.vector_store %arg6[%c0_96, %c0_97], %159 {strides = array<i32>} : memref<8x32xf32, #tpu.memory_space<vmem>>, vector<8x32xf32>,
      %c0_98 = arith.constant 0 : index
      %c0_99 = arith.constant 0 : index
      %164 = vector.load %arg5[%c0_98, %c0_99] : memref<8x32xf32, #tpu.memory_space<vmem>>, vector<8x32xf32>
      tpu.vector_store %arg5[%c0_98, %c0_99], %162 {strides = array<i32>} : memref<8x32xf32, #tpu.memory_space<vmem>>, vector<8x32xf32>,
      %c0_100 = arith.constant 0 : index
      %165 = arith.index_cast %137 : i32 to index
      %c0_101 = arith.constant 0 : index
      %c0_102 = arith.constant 0 : index
      %166 = vector.load %arg4[%c0_100, %165, %c0_101, %c0_102] : memref<1x8x8x32xf32, #tpu.memory_space<vmem>>, vector<1x1x8x32xf32>
      %167 = vector.shape_cast %166 : vector<1x1x8x32xf32> to vector<8x32xf32>
      %168 = vector.shape_cast %162 : vector<8x32xf32> to vector<1x1x8x32xf32>
      tpu.vector_store %arg4[%c0_100, %165, %c0_101, %c0_102], %168 {strides = array<i32>} : memref<1x8x8x32xf32, #tpu.memory_space<vmem>>, vector<1x1x8x32xf32>,
      %c5_i32 = arith.constant 5 : i32
      %c7_i32_103 = arith.constant 7 : i32
      %169 = arith.subi %c7_i32_103, %c5_i32 : i32
      %c0_104 = arith.constant 0 : index
      %170 = arith.index_cast %169 : i32 to index
      %c0_105 = arith.constant 0 : index
      %c0_106 = arith.constant 0 : index
      %171 = vector.load %arg2[%c0_104, %170, %c0_105, %c0_106] : memref<1x8x8x128xf32, #tpu.memory_space<vmem>>, vector<1x1x8x128xf32>
      %172 = vector.shape_cast %171 : vector<1x1x8x128xf32> to vector<8x128xf32>
      %c0_107 = arith.constant 0 : index
      %c0_108 = arith.constant 0 : index
      %173 = vector.load %arg5[%c0_107, %c0_108] : memref<8x32xf32, #tpu.memory_space<vmem>>, vector<8x32xf32>
      %c0_109 = arith.constant 0 : index
      %c0_110 = arith.constant 0 : index
      %c0_111 = arith.constant 0 : index
      %174 = vector.load %arg3[%c0_109, %c0_110, %c0_111] : memref<1x32x128xf32, #tpu.memory_space<vmem>>, vector<1x32x128xf32>
      %175 = vector.shape_cast %174 : vector<1x32x128xf32> to vector<32x128xf32>
      %cst_112 = arith.constant dense<0.000000e+00> : vector<8x128xf32>
      %176 = tpu.matmul %173, %175, %cst_112 {dimension_numbers = #tpu.dot_dimension_numbers<[1], [0], [0], [1], [0, 0, 1, 1], [], []>} : vector<8x32xf32>, vector<32x128xf32>, vector<8x128xf32> -> vector<8x128xf32>
      %177 = arith.addf %172, %176 : vector<8x128xf32>
      %178 = vector.extract_strided_slice %177 {offsets = [0, 0], sizes = [8, 96], strides = [1, 1]} : vector<8x128xf32> to vector<8x96xf32>
      %179 = arith.negf %178 : vector<8x96xf32>
      %180 = math.exp %179 : vector<8x96xf32>
      %cst_113 = arith.constant 1.000000e+00 : f32
      %181 = vector.broadcast %cst_113 : f32 to vector<8x96xf32>
      %182 = arith.addf %181, %180 : vector<8x96xf32>
      %183 = arith.divf %181, %182 : vector<8x96xf32>
      %184 = vector.extract_strided_slice %177 {offsets = [0, 96], sizes = [8, 32], strides = [1, 1]} : vector<8x128xf32> to vector<8x32xf32>
      %185 = math.tanh %184 : vector<8x32xf32>
      %186 = vector.extract_strided_slice %183 {offsets = [0, 32], sizes = [8, 32], strides = [1, 1]} : vector<8x96xf32> to vector<8x32xf32>
      %c0_114 = arith.constant 0 : index
      %c0_115 = arith.constant 0 : index
      %187 = vector.load %arg6[%c0_114, %c0_115] : memref<8x32xf32, #tpu.memory_space<vmem>>, vector<8x32xf32>
      %188 = arith.mulf %186, %187 : vector<8x32xf32>
      %189 = vector.extract_strided_slice %183 {offsets = [0, 0], sizes = [8, 32], strides = [1, 1]} : vector<8x96xf32> to vector<8x32xf32>
      %190 = arith.mulf %189, %185 : vector<8x32xf32>
      %191 = arith.addf %188, %190 : vector<8x32xf32>
      %192 = vector.extract_strided_slice %183 {offsets = [0, 64], sizes = [8, 32], strides = [1, 1]} : vector<8x96xf32> to vector<8x32xf32>
      %193 = math.tanh %191 : vector<8x32xf32>
      %194 = arith.mulf %192, %193 : vector<8x32xf32>
      %c0_116 = arith.constant 0 : index
      %c0_117 = arith.constant 0 : index
      %195 = vector.load %arg6[%c0_116, %c0_117] : memref<8x32xf32, #tpu.memory_space<vmem>>, vector<8x32xf32>
      tpu.vector_store %arg6[%c0_116, %c0_117], %191 {strides = array<i32>} : memref<8x32xf32, #tpu.memory_space<vmem>>, vector<8x32xf32>,
      %c0_118 = arith.constant 0 : index
      %c0_119 = arith.constant 0 : index
      %196 = vector.load %arg5[%c0_118, %c0_119] : memref<8x32xf32, #tpu.memory_space<vmem>>, vector<8x32xf32>
      tpu.vector_store %arg5[%c0_118, %c0_119], %194 {strides = array<i32>} : memref<8x32xf32, #tpu.memory_space<vmem>>, vector<8x32xf32>,
      %c0_120 = arith.constant 0 : index
      %197 = arith.index_cast %169 : i32 to index
      %c0_121 = arith.constant 0 : index
      %c0_122 = arith.constant 0 : index
      %198 = vector.load %arg4[%c0_120, %197, %c0_121, %c0_122] : memref<1x8x8x32xf32, #tpu.memory_space<vmem>>, vector<1x1x8x32xf32>
      %199 = vector.shape_cast %198 : vector<1x1x8x32xf32> to vector<8x32xf32>
      %200 = vector.shape_cast %194 : vector<8x32xf32> to vector<1x1x8x32xf32>
      tpu.vector_store %arg4[%c0_120, %197, %c0_121, %c0_122], %200 {strides = array<i32>} : memref<1x8x8x32xf32, #tpu.memory_space<vmem>>, vector<1x1x8x32xf32>,
      %c6_i32 = arith.constant 6 : i32
      %c7_i32_123 = arith.constant 7 : i32
      %201 = arith.subi %c7_i32_123, %c6_i32 : i32
      %c0_124 = arith.constant 0 : index
      %202 = arith.index_cast %201 : i32 to index
      %c0_125 = arith.constant 0 : index
      %c0_126 = arith.constant 0 : index
      %203 = vector.load %arg2[%c0_124, %202, %c0_125, %c0_126] : memref<1x8x8x128xf32, #tpu.memory_space<vmem>>, vector<1x1x8x128xf32>
      %204 = vector.shape_cast %203 : vector<1x1x8x128xf32> to vector<8x128xf32>
      %c0_127 = arith.constant 0 : index
      %c0_128 = arith.constant 0 : index
      %205 = vector.load %arg5[%c0_127, %c0_128] : memref<8x32xf32, #tpu.memory_space<vmem>>, vector<8x32xf32>
      %c0_129 = arith.constant 0 : index
      %c0_130 = arith.constant 0 : index
      %c0_131 = arith.constant 0 : index
      %206 = vector.load %arg3[%c0_129, %c0_130, %c0_131] : memref<1x32x128xf32, #tpu.memory_space<vmem>>, vector<1x32x128xf32>
      %207 = vector.shape_cast %206 : vector<1x32x128xf32> to vector<32x128xf32>
      %cst_132 = arith.constant dense<0.000000e+00> : vector<8x128xf32>
      %208 = tpu.matmul %205, %207, %cst_132 {dimension_numbers = #tpu.dot_dimension_numbers<[1], [0], [0], [1], [0, 0, 1, 1], [], []>} : vector<8x32xf32>, vector<32x128xf32>, vector<8x128xf32> -> vector<8x128xf32>
      %209 = arith.addf %204, %208 : vector<8x128xf32>
      %210 = vector.extract_strided_slice %209 {offsets = [0, 0], sizes = [8, 96], strides = [1, 1]} : vector<8x128xf32> to vector<8x96xf32>
      %211 = arith.negf %210 : vector<8x96xf32>
      %212 = math.exp %211 : vector<8x96xf32>
      %cst_133 = arith.constant 1.000000e+00 : f32
      %213 = vector.broadcast %cst_133 : f32 to vector<8x96xf32>
      %214 = arith.addf %213, %212 : vector<8x96xf32>
      %215 = arith.divf %213, %214 : vector<8x96xf32>
      %216 = vector.extract_strided_slice %209 {offsets = [0, 96], sizes = [8, 32], strides = [1, 1]} : vector<8x128xf32> to vector<8x32xf32>
      %217 = math.tanh %216 : vector<8x32xf32>
      %218 = vector.extract_strided_slice %215 {offsets = [0, 32], sizes = [8, 32], strides = [1, 1]} : vector<8x96xf32> to vector<8x32xf32>
      %c0_134 = arith.constant 0 : index
      %c0_135 = arith.constant 0 : index
      %219 = vector.load %arg6[%c0_134, %c0_135] : memref<8x32xf32, #tpu.memory_space<vmem>>, vector<8x32xf32>
      %220 = arith.mulf %218, %219 : vector<8x32xf32>
      %221 = vector.extract_strided_slice %215 {offsets = [0, 0], sizes = [8, 32], strides = [1, 1]} : vector<8x96xf32> to vector<8x32xf32>
      %222 = arith.mulf %221, %217 : vector<8x32xf32>
      %223 = arith.addf %220, %222 : vector<8x32xf32>
      %224 = vector.extract_strided_slice %215 {offsets = [0, 64], sizes = [8, 32], strides = [1, 1]} : vector<8x96xf32> to vector<8x32xf32>
      %225 = math.tanh %223 : vector<8x32xf32>
      %226 = arith.mulf %224, %225 : vector<8x32xf32>
      %c0_136 = arith.constant 0 : index
      %c0_137 = arith.constant 0 : index
      %227 = vector.load %arg6[%c0_136, %c0_137] : memref<8x32xf32, #tpu.memory_space<vmem>>, vector<8x32xf32>
      tpu.vector_store %arg6[%c0_136, %c0_137], %223 {strides = array<i32>} : memref<8x32xf32, #tpu.memory_space<vmem>>, vector<8x32xf32>,
      %c0_138 = arith.constant 0 : index
      %c0_139 = arith.constant 0 : index
      %228 = vector.load %arg5[%c0_138, %c0_139] : memref<8x32xf32, #tpu.memory_space<vmem>>, vector<8x32xf32>
      tpu.vector_store %arg5[%c0_138, %c0_139], %226 {strides = array<i32>} : memref<8x32xf32, #tpu.memory_space<vmem>>, vector<8x32xf32>,
      %c0_140 = arith.constant 0 : index
      %229 = arith.index_cast %201 : i32 to index
      %c0_141 = arith.constant 0 : index
      %c0_142 = arith.constant 0 : index
      %230 = vector.load %arg4[%c0_140, %229, %c0_141, %c0_142] : memref<1x8x8x32xf32, #tpu.memory_space<vmem>>, vector<1x1x8x32xf32>
      %231 = vector.shape_cast %230 : vector<1x1x8x32xf32> to vector<8x32xf32>
      %232 = vector.shape_cast %226 : vector<8x32xf32> to vector<1x1x8x32xf32>
      tpu.vector_store %arg4[%c0_140, %229, %c0_141, %c0_142], %232 {strides = array<i32>} : memref<1x8x8x32xf32, #tpu.memory_space<vmem>>, vector<1x1x8x32xf32>,
      %c7_i32_143 = arith.constant 7 : i32
      %c7_i32_144 = arith.constant 7 : i32
      %233 = arith.subi %c7_i32_144, %c7_i32_143 : i32
      %c0_145 = arith.constant 0 : index
      %234 = arith.index_cast %233 : i32 to index
      %c0_146 = arith.constant 0 : index
      %c0_147 = arith.constant 0 : index
      %235 = vector.load %arg2[%c0_145, %234, %c0_146, %c0_147] : memref<1x8x8x128xf32, #tpu.memory_space<vmem>>, vector<1x1x8x128xf32>
      %236 = vector.shape_cast %235 : vector<1x1x8x128xf32> to vector<8x128xf32>
      %c0_148 = arith.constant 0 : index
      %c0_149 = arith.constant 0 : index
      %237 = vector.load %arg5[%c0_148, %c0_149] : memref<8x32xf32, #tpu.memory_space<vmem>>, vector<8x32xf32>
      %c0_150 = arith.constant 0 : index
      %c0_151 = arith.constant 0 : index
      %c0_152 = arith.constant 0 : index
      %238 = vector.load %arg3[%c0_150, %c0_151, %c0_152] : memref<1x32x128xf32, #tpu.memory_space<vmem>>, vector<1x32x128xf32>
      %239 = vector.shape_cast %238 : vector<1x32x128xf32> to vector<32x128xf32>
      %cst_153 = arith.constant dense<0.000000e+00> : vector<8x128xf32>
      %240 = tpu.matmul %237, %239, %cst_153 {dimension_numbers = #tpu.dot_dimension_numbers<[1], [0], [0], [1], [0, 0, 1, 1], [], []>} : vector<8x32xf32>, vector<32x128xf32>, vector<8x128xf32> -> vector<8x128xf32>
      %241 = arith.addf %236, %240 : vector<8x128xf32>
      %242 = vector.extract_strided_slice %241 {offsets = [0, 0], sizes = [8, 96], strides = [1, 1]} : vector<8x128xf32> to vector<8x96xf32>
      %243 = arith.negf %242 : vector<8x96xf32>
      %244 = math.exp %243 : vector<8x96xf32>
      %cst_154 = arith.constant 1.000000e+00 : f32
      %245 = vector.broadcast %cst_154 : f32 to vector<8x96xf32>
      %246 = arith.addf %245, %244 : vector<8x96xf32>
      %247 = arith.divf %245, %246 : vector<8x96xf32>
      %248 = vector.extract_strided_slice %241 {offsets = [0, 96], sizes = [8, 32], strides = [1, 1]} : vector<8x128xf32> to vector<8x32xf32>
      %249 = math.tanh %248 : vector<8x32xf32>
      %250 = vector.extract_strided_slice %247 {offsets = [0, 32], sizes = [8, 32], strides = [1, 1]} : vector<8x96xf32> to vector<8x32xf32>
      %c0_155 = arith.constant 0 : index
      %c0_156 = arith.constant 0 : index
      %251 = vector.load %arg6[%c0_155, %c0_156] : memref<8x32xf32, #tpu.memory_space<vmem>>, vector<8x32xf32>
      %252 = arith.mulf %250, %251 : vector<8x32xf32>
      %253 = vector.extract_strided_slice %247 {offsets = [0, 0], sizes = [8, 32], strides = [1, 1]} : vector<8x96xf32> to vector<8x32xf32>
      %254 = arith.mulf %253, %249 : vector<8x32xf32>
      %255 = arith.addf %252, %254 : vector<8x32xf32>
      %256 = vector.extract_strided_slice %247 {offsets = [0, 64], sizes = [8, 32], strides = [1, 1]} : vector<8x96xf32> to vector<8x32xf32>
      %257 = math.tanh %255 : vector<8x32xf32>
      %258 = arith.mulf %256, %257 : vector<8x32xf32>
      %c0_157 = arith.constant 0 : index
      %c0_158 = arith.constant 0 : index
      %259 = vector.load %arg6[%c0_157, %c0_158] : memref<8x32xf32, #tpu.memory_space<vmem>>, vector<8x32xf32>
      tpu.vector_store %arg6[%c0_157, %c0_158], %255 {strides = array<i32>} : memref<8x32xf32, #tpu.memory_space<vmem>>, vector<8x32xf32>,
      %c0_159 = arith.constant 0 : index
      %c0_160 = arith.constant 0 : index
      %260 = vector.load %arg5[%c0_159, %c0_160] : memref<8x32xf32, #tpu.memory_space<vmem>>, vector<8x32xf32>
      tpu.vector_store %arg5[%c0_159, %c0_160], %258 {strides = array<i32>} : memref<8x32xf32, #tpu.memory_space<vmem>>, vector<8x32xf32>,
      %c0_161 = arith.constant 0 : index
      %261 = arith.index_cast %233 : i32 to index
      %c0_162 = arith.constant 0 : index
      %c0_163 = arith.constant 0 : index
      %262 = vector.load %arg4[%c0_161, %261, %c0_162, %c0_163] : memref<1x8x8x32xf32, #tpu.memory_space<vmem>>, vector<1x1x8x32xf32>
      %263 = vector.shape_cast %262 : vector<1x1x8x32xf32> to vector<8x32xf32>
      %264 = vector.shape_cast %258 : vector<8x32xf32> to vector<1x1x8x32xf32>
      tpu.vector_store %arg4[%c0_161, %261, %c0_162, %c0_163], %264 {strides = array<i32>} : memref<1x8x8x32xf32, #tpu.memory_space<vmem>>, vector<1x1x8x32xf32>,
      %c8_i32 = arith.constant 8 : i32
    } else {
    }
    return
  }
  func.func @transform_0(%arg0: i32, %arg1: i32) -> (i32, i32, i32, i32) {
    %c2_i32 = arith.constant 2 : i32
    %0 = arith.muli %c2_i32, %arg1 : i32
    %c0_i32 = arith.constant 0 : i32
    %1 = arith.subi %c0_i32, %0 : i32
    %2 = arith.muli %arg0, %1 : i32
    %3 = arith.addi %arg1, %2 : i32
    %c0_i32_0 = arith.constant 0 : i32
    %c0_i32_1 = arith.constant 0 : i32
    %c0_i32_2 = arith.constant 0 : i32
    return %arg0, %3, %c0_i32_0, %c0_i32_1 : i32, i32, i32, i32
  }
  func.func @transform_1(%arg0: i32, %arg1: i32) -> (i32, i32, i32) {
    %c0_i32 = arith.constant 0 : i32
    %c0_i32_0 = arith.constant 0 : i32
    %c0_i32_1 = arith.constant 0 : i32
    return %arg0, %c0_i32, %c0_i32_0 : i32, i32, i32
  }
  func.func @transform_2(%arg0: i32, %arg1: i32) -> (i32, i32, i32, i32) {
    %c2_i32 = arith.constant 2 : i32
    %0 = arith.muli %c2_i32, %arg1 : i32
    %c0_i32 = arith.constant 0 : i32
    %1 = arith.subi %c0_i32, %0 : i32
    %2 = arith.muli %arg0, %1 : i32
    %3 = arith.addi %arg1, %2 : i32
    %c0_i32_0 = arith.constant 0 : i32
    %c0_i32_1 = arith.constant 0 : i32
    %c0_i32_2 = arith.constant 0 : i32
    return %arg0, %3, %c0_i32_0, %c0_i32_1 : i32, i32, i32, i32
  }
}

</mosaic_0001>

<bundles_post_ra>
// kernel: bilstm_forward.2
= control target key start
LH: loop header
LB: loop body
LE: loop exit
PB: predicated region body
PF: predicated region fallthrough
CT: control target
= control target key end

     0   :  { %7 = vsyncpa [#allocation5], 0  ;;  %s3724_s0 = inlined_call_operand.hbm [shape: f32[2,8,8,128], index: 0, kind: input, shape index: {}]   ;;  %s3725_s1 = inlined_call_operand.hbm [shape: f32[2,32,128], index: 1, kind: input, shape index: {}]   ;;  %s3726_s2 = inlined_call_operand.hbm [shape: f32[2,8,8,32], index: 2, kind: output, shape index: {}]  }
   0x1   :  { %9 = vsyncpa [#allocation5 + $0x1], 0 }
   0x2   :  { %10 = vsyncpa [#allocation8], 0 }
   0x3   :  { %12 = vsyncpa [#allocation8 + $0x1], 0 }
   0x4   :  { %13 = vsyncpa [#allocation6], 0 }
   0x5   :  { %15 = vsyncpa [#allocation6 + $0x1], 0  ;;  %s3178_s9 = smov 0   ;;  %s3180_s10 = smov 0  }
   0x6   :  { %s3182_s11 = smov 0   ;;  %s3184_s12 = smov 0  }
   0x7   :  { %s3186_s13 = smov 0   ;;  %s3188_s14 = smov 0  }
   0x8 LB: > { %s2347_s15 = sadd.s32 4294967295, %s3141_s14   ;;  %s2348_s16 = sadd.s32 4294967294, %s3141_s14   ;;  %s3141_s14 = sphi %s3188_s14, %s21_s14   ;;  %s3137_s13 = sphi %s3186_s13, %s3744_s13   ;;  %s3133_s12 = sphi %s3184_s12, %s3743_s12   ;;  %s3129_s11 = sphi %s3182_s11, %s3742_s11   ;;  %s3125_s10 = sphi %s3180_s10, %s3741_s10   ;;  %s3121_s9 = sphi %s3178_s9, %s3740_s9  }
   0x9   : > { %s33_s17 = sadd.s32 1, %s3137_s13  ;;  %s50_s18 = sadd.s32 1, %s3129_s11 }
   0xa   : > { %p35_p0 = scmp.ge.s32.totalorder %s33_s17, 2  ;;  %p57_p1 = scmp.ne.s32.totalorder %s3129_s11, %s3125_s10 }
   0xb   : > { %p58_p2 = scmp.eq.s32.totalorder %s3141_s14, 0  ;;  %p63_p3 = scmp.ne.s32.totalorder %s3125_s10, %s3121_s9 }
   0xc   : > { %s3746_s17 = smov (%p35_p0, %s33_s17), 0  ;;  %p64_p5 = scmp.eq.s32.totalorder %s2347_s15, 0 }
   0xd   : > { %p3219_p4 = por %p58_p2, %p57_p1  ;;  %s45_s20 = ssub.s32 %s3137_s13, %s3746_s17 }
   0xe   : > { %p123_p6 = scmp.eq.s32.totalorder %s2347_s15, 1  ;;  %p48_p7 = scmp.eq.s32.totalorder %s45_s20, 0 }
   0xf   : > { %p3225_p8 = por %p64_p5, %p63_p3  ;;  %p129_p10 = scmp.eq.s32.totalorder %s2348_s16, 1 }
  0x10   : > { %p3229_p9 = por %p123_p6, %p57_p1  ;;  %p2800_p13 = scmp.lt.s32.totalorder %s3141_s14, 2 }
  0x11   : > { %s3730_s21 = scalar_select %p3225_p8, 1, 0 }
  0x12   : > { %s3731_s22 = scalar_select %p3229_p9, 1, 0 }
  0x13   : > { %s3234_s23 = scalar_select %p48_p7, %s3129_s11, %s50_s18  }
  0x14   : > { %p3236_p11 = por %p129_p10, %p63_p3  ;;  %s3243_s25 = sand.u32 1, %s3129_s11  }
  0x15   : > { %s2351_s26 = sshll.u32 %s3243_s25, 6  ;;  %s2428_s27 = sshll.u32 %s3137_s13, 10 }
  0x16   : > { %s3732_s24 = scalar_select %p3236_p11, 1, 0 }
  0x17   : > { %s3250_s30 = scalar_lea.hbm %s3724_s0, %s2428_s27  ;;  %s153_s3 = scalar_lea.vmem [#allocation4], %s2351_s26 }
  0x18   : > { %s166_s4 = sshll.u32 %s153_s3, 4  ;;  %p3256_p0 = pnand %p2800_p13, %p3219_p4  ;;  %s3252_s4 = int_to_ptr.vmem [resolvable:$true] %s166_s4 }
  0x19   : > { %s150_s6 = scalar_lea.sflag [#allocation5], %s3243_s25  ;;  %s2995_s7 = scalar_lea.hbm %s3250_s30, 1024 }
  0x1a   : > { %p2996_p2 = scmp.ne.s32.totalorder %s3250_s30, %s2995_s7  ;;  %p2997_p3 = pneg %p3256_p0 }
  0x1b   : > { %s3000_s16 = scalar_lea.hbm %s3724_s0, 2048  ;;  %p3001_p4 = scmp.lt.u32.totalorder %s3250_s30, %s3724_s0 }
  0x1c   : > { %p2998_p5 = pnand %p2997_p3, %p2996_p2  ;;  %p3002_p7 = scmp.lt.u32.totalorder %s3000_s16, %s2995_s7 }
  0x1d   : > { %p3004_p13 = scmp.lt.u32.totalorder %s2995_s7, %s3250_s30 }
  0x1e   : > { %p2999_p6 = pneg %p2998_p5  ;;  %p3003_p10 = por %p3002_p7, %p3001_p4 }
  0x20   : > { %p3005_p12 = por %p3004_p13, %p3003_p10 }
  0x22   : > { %p3006_p1 = pnand %p3005_p12, %p2999_p6 }
  0x24   : > { %3009 = shalt.err (!%p3006_p1)
}
  0x25   : > { %s3010_s20 = scalar_lea.vmem %s3252_s4, 1024  ;;  %s3143_s26 = smov [#allocation4]  }
  0x26   : > { %p3011_p2 = scmp.ne.s32.totalorder %s3252_s4, %s3010_s20  ;;  %s3015_s27 = sshll.u32 %s3143_s26, 4  ;;  %s3016_s27 = int_to_ptr.vmem [resolvable:$false] %s3015_s27 }
  0x27   : > { %s3017_s28 = scalar_lea.vmem %s3016_s27, 2048  ;;  %p3018_p9 = scmp.lt.s32.totalorder %s3252_s4, %s3016_s27 }
  0x28   : > { %p3013_p5 = pnand %p3011_p2, %p2997_p3  ;;  %p3019_p4 = scmp.lt.s32.totalorder %s3017_s28, %s3010_s20 }
  0x2a   : > { %p3014_p11 = pneg %p3013_p5  ;;  %p3020_p7 = por %p3019_p4, %p3018_p9 }
  0x2c   : > { %p3021_p10 = pnand %p3020_p7, %p3014_p11 }
  0x2e   : > { %3024 = shalt.err (!%p3021_p10)
}
  0x2f   : > { %s3144_s29 = smov 128   ;;  %s3145_s3 = smov 8  }
  0x30   : > { %2792 = dma.hbm_to_vmem [thread:$0]  (!%p3256_p0), %s3250_s30, 1024, %s3252_s4, %s150_s6, %s3144_s29, %s3144_s29, %s3145_s3  }
  0x31   : > { %p195_p9 = scmp.lt.s32.totalorder %s3141_s14, 3  ;;  %s2354_s7 = sshll.u32 %s3243_s25, 5 }
  0x32   : > { %s2429_s8 = sshll.u32 %s3137_s13, 9  ;;  %p3734_p11 = scmp.ge.s32.totalorder %s3141_s14, 1 }
  0x33   : > { %s3304_s19 = scalar_lea.hbm %s3725_s1, %s2429_s8  ;;  %s180_s20 = scalar_lea.vmem [#allocation7], %s2354_s7 }
  0x34   : > { %p3297_p12 = pnand %p3734_p11, %p195_p9  ;;  %s187_s26 = sshll.u32 %s180_s20, 4  ;;  %s3306_s26 = int_to_ptr.vmem [resolvable:$true] %s187_s26 }
  0x35   : > { %s177_s30 = scalar_lea.sflag [#allocation8], %s3243_s25  ;;  %s3025_s4 = scalar_lea.hbm %s3304_s19, 512 }
  0x36   : > { %p3026_p1 = scmp.ne.s32.totalorder %s3304_s19, %s3025_s4  ;;  %s3030_s28 = scalar_lea.hbm %s3725_s1, 1024 }
  0x37   : > { %p3031_p2 = scmp.lt.u32.totalorder %s3304_s19, %s3725_s1  ;;  %p3032_p5 = scmp.lt.u32.totalorder %s3030_s28, %s3025_s4 }
  0x38   : > { %p3028_p6 = pnand %p3026_p1, %p2997_p3  ;;  %p3034_p7 = scmp.lt.u32.totalorder %s3025_s4, %s3304_s19 }
  0x39   : > { %p3033_p4 = por %p3032_p5, %p3031_p2 }
  0x3a   : > { %p3029_p13 = pneg %p3028_p6 }
  0x3b   : > { %p3035_p10 = por %p3034_p7, %p3033_p4 }
  0x3d   : > { %p3036_p9 = pnand %p3035_p10, %p3029_p13 }
  0x3f   : > { %3039 = shalt.err (!%p3036_p9)
}
  0x40   : > { %s3040_s7 = scalar_lea.vmem %s3306_s26, 512  ;;  %s3146_s18 = smov [#allocation7]  }
  0x41   : > { %p3041_p11 = scmp.ne.s32.totalorder %s3306_s26, %s3040_s7  ;;  %s3045_s20 = sshll.u32 %s3146_s18, 4  ;;  %s3046_s20 = int_to_ptr.vmem [resolvable:$false] %s3045_s20 }
  0x42   : > { %s3047_s6 = scalar_lea.vmem %s3046_s20, 1024  ;;  %p3048_p8 = scmp.lt.s32.totalorder %s3306_s26, %s3046_s20 }
  0x43   : > { %p3043_p1 = pnand %p3041_p11, %p2997_p3  ;;  %p3049_p2 = scmp.lt.s32.totalorder %s3047_s6, %s3040_s7 }
  0x45   : > { %p3044_p6 = pneg %p3043_p1  ;;  %p3050_p5 = por %p3049_p2, %p3048_p8 }
  0x47   : > { %p3051_p4 = pnand %p3050_p5, %p3044_p6 }
  0x49   : > { %3054 = shalt.err (!%p3051_p4)
}
  0x4a   : > { %2795 = dma.hbm_to_vmem [thread:$0]  (!%p3256_p0), %s3304_s19, 512, %s3306_s26, %s177_s30, %s3144_s29, %s3144_s29, %s3145_s3  }
  0x4b   : > { %199 = sbr.rel (%p3297_p12) target bundleno = 11480 (0x2cd8), region = 28  ;;  %s3340_s4 = sand.u32 (!%p3297_p12), 1, %s3125_s10  }
  0x4c   : > { %s2358_s27 = sshll.u32 (!%p3297_p12), %s3340_s4, 6  ;;  %s202_s28 = scalar_lea.sflag (!%p3297_p12), [#allocation5], %s3340_s4 }
  0x4d   : > { %s3344_s5 = scalar_lea.vmem (!%p3297_p12), [#allocation4], %s2358_s27  ;;  %p3736_p8 = scmp.ne.s32.totalorder (!%p3297_p12), %s3730_s21, 0 }
  0x52   : > { %3108 = dma.done.wait (%p3736_p8), %s202_s28, 1024  }
  0x53   : > { %3110 = vsyncadd (%p3736_p8), %s202_s28, 4294966272  ;;  %s2359_s25 = sshll.u32 %s3340_s4, 5  ;;  %s211_s29 = scalar_lea.sflag [#allocation8], %s3340_s4 }
  0x54   : > { %s3352_s3 = scalar_lea.vmem [#allocation7], %s2359_s25 }
  0x55   : > { %3112 = dma.done.wait (%p3736_p8), %s211_s29, 512  }
  0x56   : > { %3114 = vsyncadd (%p3736_p8), %s211_s29, 4294966784  ;;  %vm254_vm0 = vcmask 261120   ;;  %v3147_v0 = vmov 0.0   ;;  %s3360_s15 = scalar_lea.vmem [#allocation9], %s2358_s27  ;;  %p2361_p0 = scmp.ne.s32.totalorder %s3133_s12, 0 }
  0x57   : > { %255 = vst.msk [vmem:[#allocation2] sm:$0xff] %vm254_vm0, %v3147_v0  ;;  %256 = vst.msk [vmem:[#allocation3] sm:$0xff] %vm254_vm0, %v3147_v0  ;;  %v263_v1 = vld [vmem:[%s3352_s3] sm:$0xff] (!%p2361_p0)  ;;  %v264_v2 = vld [vmem:[%s3352_s3 + $0x8] sm:$0xff] (!%p2361_p0)  ;;  %v3148_v4 = vmov (!%p2361_p0), 0.0|0.0   ;;  %vm3149_vm1 = vmmov (!%p2361_p0), 0  }
  0x58   : > { %260 = sbr.rel (%p2361_p0) target bundleno = 5770 (0x168a), region = 44  ;;  %v265_v3 = vld [vmem:[%s3352_s3 + $0x10] sm:$0xff] (!%p2361_p0)  ;;  %2687 = vmatprep.subr.bf16.mxu0 (!%p2361_p0), %v3148_v4  ;;  %v3367_v5 = vpack.c.bf16 (!%p2361_p0), %v264_v2, %v263_v1  ;;  %v266_v6 = vld [vmem:[%s3352_s3 + $0x18] sm:$0xff] (!%p2361_p0)  ;;  %v3150_v7 = vmov (!%p2361_p0), 0.0   ;;  %2693 = vmatprep.subr.bf16.mxu1 (!%p2361_p0), %v3148_v4  ;;  %v261_v10 = vld [vmem:[%s3344_s5] sm:$0xff] (!%p2361_p0)  ;;  %s3151_s21 = smov (!%p2361_p0), 32  }
  0x59   : > { %2519 = vmatprep.mubr.msk.f32.mxu0 (!%p2361_p0), %vm3149_vm1, %v3150_v7  ;;  %2530 = vmatprep.mubr.msk.f32.mxu1 (!%p2361_p0), %vm3149_vm1, %v3150_v7  ;;  %v3376_v8 = vpack.c.bf16 (!%p2361_p0), %v266_v6, %v265_v3  ;;  %s3152_s19 = smov (!%p2361_p0), 96   ;;  %s3153_s26 = smov (!%p2361_p0), 64   ;;  %v2364_v33 = vld [vmem:[%s3344_s5 + $0x8] sm:$0xff] (!%p2361_p0)  ;;  %v2368_v55 = vld [vmem:[%s3344_s5 + $0x10] sm:$0xff] (!%p2361_p0) }
  0x5a   : > { %2689 = vmatpush3.bf16.msra.mxu0 (!%p2361_p0), %v3367_v5  ;;  %2695 = vmatpush3.bf16.msra.mxu1 (!%p2361_p0), %v3367_v5 }
  0x5b   : > { %2690 = vmatprep.subr.bf16.mxu0 (!%p2361_p0), %v3148_v4  ;;  %2696 = vmatprep.subr.bf16.mxu1 (!%p2361_p0), %v3148_v4 }
  0x5e   : > { %2692 = vmatpush3.bf16.msra.mxu0 (!%p2361_p0), %v3376_v8  ;;  %v262_v9 = vld [vmem:[#allocation2] sm:$0xff] (!%p2361_p0)  ;;  %2698 = vmatpush3.bf16.msra.mxu1 (!%p2361_p0), %v3376_v8  ;;  %v349_v15 = vld [vmem:[#allocation3] sm:$0xff] (!%p2361_p0) }
  0x5f   : > { %2699 = vmatprep.subr.bf16.mxu0 %v3148_v4  ;;  %2705 = vmatprep.subr.bf16.mxu1 %v3148_v4 }
  0x61   : > { %2520 = vmatmul.mubr.msk.f32.vlgmr.msra.gmra.mrb[0].mxu0 %vm254_vm0, %v262_v9 }
  0x62   : > { %2701 = vmatpush3.bf16.msra.mxu0 %v3367_v5  ;;  %2541 = vmatprep.mubr.msk.f32.mxu0 %vm3149_vm1, %v3150_v7 }
  0x63   : > { %2702 = vmatprep.subr.bf16.mxu0 %v3148_v4 }
  0x66   : > { %2704 = vmatpush3.bf16.msra.mxu0 %v3376_v8 }
  0x67   : > { %2711 = vmatprep.subr.bf16.mxu0 %v3148_v4 }
 0x134   : > { %v337_v11 = vpop.f32.mrb[0].mxu0 }
 0x135   : > { %v341_v12 = vadd.f32 %v337_v11, %v261_v10  ;;  %v2521_v13 = vpop.f32.mrb[1].mxu0 }
 0x137   : > { %2867 = vtanh.f32 %v341_v12  ;;  %v2363_v16 = vmul.f32 -1.442695, %v341_v12 }
 0x139   : > { %2869 = vpow2.f32 %v2363_v16 }
 0x141   : > { %v2868_v14 = vpop.eup %2867 }
 0x142   : > { %356 = vrot.lane.b32.xlu0 %v2868_v14, %s3151_s21 }
 0x143   : > { %v2870_v17 = vpop.eup %2869 }
 0x144   : > { %v345_v18 = vadd.f32 1.0, %v2870_v17  ;;  %v2372_v17 = vld [vmem:[%s3344_s5 + $0x18] sm:$0xff] }
 0x146   : > { %351 = vrot.lane.b32.xlu0 %v349_v15, %s3151_s21  ;;  %2871 = vrcp.f32 %v345_v18 }
 0x150   : > { %v2872_v19 = vpop.eup %2871 }
 0x1b4   : > { %v357_v20 = vpop.permute.xlu0 %356 }
 0x1b5   : > { %v359_v21 = vmul.f32 %v2872_v19, %v357_v20 }
 0x1b7   : > { %361 = vrot.lane.b32.xlu1 %v359_v21, %s3151_s21 }
 0x1b8   : > { %v352_v22 = vpop.permute.xlu0 %351 }
 0x1b9   : > { %v354_v23 = vmul.f32 %v2872_v19, %v352_v22 }
 0x229   : > { %v362_v24 = vpop.permute.xlu1 %361 }
 0x22a   : > { %v364_v25 = vadd.f32 %v362_v24, %v354_v23 }
 0x22c   : > { %2873 = vtanh.f32 %v364_v25 }
 0x236   : > { %v2874_v26 = vpop.eup %2873 }
 0x237   : > { %367 = vrot.lane.b32.xlu1 %v2874_v26, %s3151_s21 }
 0x23b   : > { %372 = vrot.lane.b32.xlu1 %v364_v25, %s3152_s19 }
 0x2a9   : > { %v368_v27 = vpop.permute.xlu1 %367 }
 0x2aa   : > { %v370_v28 = vmul.f32 %v2872_v19, %v368_v27 }
 0x2ac   : > { %377 = vrot.lane.b32.xlu0 %v370_v28, %s3153_s26 }
 0x2ad   : > { %v373_v29 = vpop.permute.xlu1 %372 }
 0x2ae   : > { %375 = vst.msk [vmem:[#allocation3] sm:$0xff] %vm254_vm0, %v373_v29 }
 0x2b5   : > { %v470_v30 = vld [vmem:[#allocation3] sm:$0xff] }
 0x2b6   : > { %472 = vrot.lane.b32.xlu1 %v470_v30, %s3151_s21 }
 0x31e   : > { %v378_v31 = vpop.permute.xlu0 %377 }
 0x31f   : > { %380 = vst.msk [vmem:[#allocation2] sm:$0xff] %vm254_vm0, %v378_v31  ;;  %381 = vst.msk [vmem:[%s3360_s15] sm:$0xff] %vm254_vm0, %v378_v31 }
 0x326   : > { %v384_v32 = vld [vmem:[#allocation2] sm:$0xff] }
 0x327   : > { %2531 = vmatmul.mubr.msk.f32.vlgmr.msra.gmra.mrb[0].mxu1 %vm254_vm0, %v384_v32 }
 0x328   : > { %2707 = vmatpush3.bf16.msra.mxu1 %v3367_v5  ;;  %2552 = vmatprep.mubr.msk.f32.mxu1 %vm3149_vm1, %v3150_v7  ;;  %v473_v44 = vpop.permute.xlu1 %472 }
 0x329   : > { %2708 = vmatprep.subr.bf16.mxu1 %v3148_v4 }
 0x32c   : > { %2710 = vmatpush3.bf16.msra.mxu1 %v3376_v8 }
 0x32d   : > { %2717 = vmatprep.subr.bf16.mxu1 %v3148_v4 }
 0x3fa   : > { %v458_v34 = vpop.f32.mrb[0].mxu1 }
 0x3fb   : > { %v462_v35 = vadd.f32 %v2364_v33, %v458_v34  ;;  %v2532_v36 = vpop.f32.mrb[1].mxu1 }
 0x3fd   : > { %2875 = vtanh.f32 %v462_v35  ;;  %v2366_v38 = vmul.f32 -1.442695, %v462_v35 }
 0x3ff   : > { %2877 = vpow2.f32 %v2366_v38 }
 0x407   : > { %v2876_v37 = vpop.eup %2875 }
 0x408   : > { %477 = vrot.lane.b32.xlu0 %v2876_v37, %s3151_s21 }
 0x409   : > { %v2878_v39 = vpop.eup %2877 }
 0x40a   : > { %v466_v40 = vadd.f32 1.0, %v2878_v39  ;;  %v2376_v39 = vld [vmem:[%s3344_s5 + $0x20] sm:$0xff] }
 0x40c   : > { %2879 = vrcp.f32 %v466_v40 }
 0x416   : > { %v2880_v41 = vpop.eup %2879 }
 0x417   : > { %v475_v45 = vmul.f32 %v2880_v41, %v473_v44 }
 0x47a   : > { %v478_v42 = vpop.permute.xlu0 %477 }
 0x47b   : > { %v480_v43 = vmul.f32 %v2880_v41, %v478_v42 }
 0x47d   : > { %482 = vrot.lane.b32.xlu0 %v480_v43, %s3151_s21 }
 0x4ef   : > { %v483_v46 = vpop.permute.xlu0 %482 }
 0x4f0   : > { %v485_v47 = vadd.f32 %v483_v46, %v475_v45 }
 0x4f2   : > { %2881 = vtanh.f32 %v485_v47 }
 0x4fc   : > { %v2882_v48 = vpop.eup %2881 }
 0x4fd   : > { %488 = vrot.lane.b32.xlu1 %v2882_v48, %s3151_s21 }
 0x501   : > { %493 = vrot.lane.b32.xlu1 %v485_v47, %s3152_s19 }
 0x56f   : > { %v489_v49 = vpop.permute.xlu1 %488 }
 0x570   : > { %v491_v50 = vmul.f32 %v2880_v41, %v489_v49 }
 0x572   : > { %498 = vrot.lane.b32.xlu0 %v491_v50, %s3153_s26 }
 0x573   : > { %v494_v51 = vpop.permute.xlu1 %493 }
 0x574   : > { %496 = vst.msk [vmem:[#allocation3] sm:$0xff] %vm254_vm0, %v494_v51 }
 0x57b   : > { %v592_v52 = vld [vmem:[#allocation3] sm:$0xff] }
 0x57c   : > { %594 = vrot.lane.b32.xlu1 %v592_v52, %s3151_s21 }
 0x5e4   : > { %v499_v53 = vpop.permute.xlu0 %498 }
 0x5e5   : > { %501 = vst.msk [vmem:[#allocation2] sm:$0xff] %vm254_vm0, %v499_v53  ;;  %2367 = vst.msk [vmem:[%s3360_s15 + $0x8] sm:$0xff] %vm254_vm0, %v499_v53 }
 0x5ec   : > { %v506_v54 = vld [vmem:[#allocation2] sm:$0xff] }
 0x5ed   : > { %2542 = vmatmul.mubr.msk.f32.vlgmr.msra.gmra.mrb[2].mxu0 %vm254_vm0, %v506_v54 }
 0x5ee   : > { %2713 = vmatpush3.bf16.msra.mxu0 %v3367_v5  ;;  %2563 = vmatprep.mubr.msk.f32.mxu0 %vm3149_vm1, %v3150_v7  ;;  %v595_v2 = vpop.permute.xlu1 %594 }
 0x5ef   : > { %2714 = vmatprep.subr.bf16.mxu0 %v3148_v4 }
 0x5f2   : > { %2716 = vmatpush3.bf16.msra.mxu0 %v3376_v8 }
 0x5f3   : > { %2723 = vmatprep.subr.bf16.mxu0 %v3148_v4 }
 0x6c0   : > { %v580_v56 = vpop.f32.mrb[2].mxu0 }
 0x6c1   : > { %v584_v57 = vadd.f32 %v2368_v55, %v580_v56  ;;  %v2543_v58 = vpop.f32.mrb[3].mxu0 }
 0x6c3   : > { %2883 = vtanh.f32 %v584_v57  ;;  %v2370_v60 = vmul.f32 -1.442695, %v584_v57 }
 0x6c5   : > { %2885 = vpow2.f32 %v2370_v60 }
 0x6cd   : > { %v2884_v59 = vpop.eup %2883 }
 0x6ce   : > { %599 = vrot.lane.b32.xlu0 %v2884_v59, %s3151_s21 }
 0x6cf   : > { %v2886_v61 = vpop.eup %2885 }
 0x6d0   : > { %v588_v62 = vadd.f32 1.0, %v2886_v61  ;;  %v2380_v61 = vld [vmem:[%s3344_s5 + $0x28] sm:$0xff] }
 0x6d2   : > { %2887 = vrcp.f32 %v588_v62 }
 0x6dc   : > { %v2888_v63 = vpop.eup %2887 }
 0x6dd   : > { %v597_v3 = vmul.f32 %v2888_v63, %v595_v2 }
 0x740   : > { %v600_v0 = vpop.permute.xlu0 %599 }
 0x741   : > { %v602_v1 = vmul.f32 %v2888_v63, %v600_v0 }
 0x743   : > { %604 = vrot.lane.b32.xlu0 %v602_v1, %s3151_s21 }
 0x7b5   : > { %v605_v6 = vpop.permute.xlu0 %604 }
 0x7b6   : > { %v607_v9 = vadd.f32 %v605_v6, %v597_v3 }
 0x7b8   : > { %2889 = vtanh.f32 %v607_v9 }
 0x7c2   : > { %v2890_v10 = vpop.eup %2889 }
 0x7c3   : > { %610 = vrot.lane.b32.xlu1 %v2890_v10, %s3151_s21 }
 0x7c7   : > { %615 = vrot.lane.b32.xlu1 %v607_v9, %s3152_s19 }
 0x835   : > { %v611_v11 = vpop.permute.xlu1 %610 }
 0x836   : > { %v613_v12 = vmul.f32 %v2888_v63, %v611_v11 }
 0x838   : > { %620 = vrot.lane.b32.xlu0 %v613_v12, %s3153_s26 }
 0x839   : > { %v616_v13 = vpop.permute.xlu1 %615 }
 0x83a   : > { %618 = vst.msk [vmem:[#allocation3] sm:$0xff] %vm254_vm0, %v616_v13 }
 0x841   : > { %v714_v14 = vld [vmem:[#allocation3] sm:$0xff] }
 0x842   : > { %716 = vrot.lane.b32.xlu1 %v714_v14, %s3151_s21 }
 0x8aa   : > { %v621_v15 = vpop.permute.xlu0 %620 }
 0x8ab   : > { %623 = vst.msk [vmem:[#allocation2] sm:$0xff] %vm254_vm0, %v621_v15  ;;  %2371 = vst.msk [vmem:[%s3360_s15 + $0x10] sm:$0xff] %vm254_vm0, %v621_v15 }
 0x8b2   : > { %v628_v16 = vld [vmem:[#allocation2] sm:$0xff] }
 0x8b3   : > { %2553 = vmatmul.mubr.msk.f32.vlgmr.msra.gmra.mrb[2].mxu1 %vm254_vm0, %v628_v16 }
 0x8b4   : > { %2719 = vmatpush3.bf16.msra.mxu1 %v3367_v5  ;;  %2574 = vmatprep.mubr.msk.f32.mxu1 %vm3149_vm1, %v3150_v7  ;;  %v717_v28 = vpop.permute.xlu1 %716 }
 0x8b5   : > { %2720 = vmatprep.subr.bf16.mxu1 %v3148_v4 }
 0x8b8   : > { %2722 = vmatpush3.bf16.msra.mxu1 %v3376_v8 }
 0x8b9   : > { %2729 = vmatprep.subr.bf16.mxu1 %v3148_v4 }
 0x986   : > { %v702_v18 = vpop.f32.mrb[2].mxu1 }
 0x987   : > { %v706_v19 = vadd.f32 %v2372_v17, %v702_v18  ;;  %v2554_v20 = vpop.f32.mrb[3].mxu1 }
 0x989   : > { %2891 = vtanh.f32 %v706_v19  ;;  %v2374_v22 = vmul.f32 -1.442695, %v706_v19  ;;  %v2384_v19 = vld [vmem:[%s3344_s5 + $0x30] sm:$0xff] }
 0x98b   : > { %2893 = vpow2.f32 %v2374_v22 }
 0x993   : > { %v2892_v21 = vpop.eup %2891 }
 0x994   : > { %721 = vrot.lane.b32.xlu0 %v2892_v21, %s3151_s21 }
 0x995   : > { %v2894_v23 = vpop.eup %2893 }
 0x996   : > { %v710_v24 = vadd.f32 1.0, %v2894_v23 }
 0x998   : > { %2895 = vrcp.f32 %v710_v24 }
 0x9a2   : > { %v2896_v25 = vpop.eup %2895 }
 0x9a3   : > { %v719_v29 = vmul.f32 %v2896_v25, %v717_v28 }
 0xa06   : > { %v722_v26 = vpop.permute.xlu0 %721 }
 0xa07   : > { %v724_v27 = vmul.f32 %v2896_v25, %v722_v26 }
 0xa09   : > { %726 = vrot.lane.b32.xlu0 %v724_v27, %s3151_s21 }
 0xa7b   : > { %v727_v30 = vpop.permute.xlu0 %726 }
 0xa7c   : > { %v729_v31 = vadd.f32 %v727_v30, %v719_v29 }
 0xa7e   : > { %2897 = vtanh.f32 %v729_v31 }
 0xa88   : > { %v2898_v32 = vpop.eup %2897 }
 0xa89   : > { %732 = vrot.lane.b32.xlu1 %v2898_v32, %s3151_s21 }
 0xa8d   : > { %737 = vrot.lane.b32.xlu1 %v729_v31, %s3152_s19 }
 0xafb   : > { %v733_v33 = vpop.permute.xlu1 %732 }
 0xafc   : > { %v735_v34 = vmul.f32 %v2896_v25, %v733_v33 }
 0xafe   : > { %742 = vrot.lane.b32.xlu0 %v735_v34, %s3153_s26 }
 0xaff   : > { %v738_v35 = vpop.permute.xlu1 %737 }
 0xb00   : > { %740 = vst.msk [vmem:[#allocation3] sm:$0xff] %vm254_vm0, %v738_v35 }
 0xb07   : > { %v836_v36 = vld [vmem:[#allocation3] sm:$0xff] }
 0xb08   : > { %838 = vrot.lane.b32.xlu1 %v836_v36, %s3151_s21 }
 0xb70   : > { %v743_v37 = vpop.permute.xlu0 %742 }
 0xb71   : > { %745 = vst.msk [vmem:[#allocation2] sm:$0xff] %vm254_vm0, %v743_v37  ;;  %2375 = vst.msk [vmem:[%s3360_s15 + $0x18] sm:$0xff] %vm254_vm0, %v743_v37 }
 0xb78   : > { %v750_v38 = vld [vmem:[#allocation2] sm:$0xff] }
 0xb79   : > { %2564 = vmatmul.mubr.msk.f32.vlgmr.msra.gmra.mrb[4].mxu0 %vm254_vm0, %v750_v38 }
 0xb7a   : > { %2725 = vmatpush3.bf16.msra.mxu0 %v3367_v5  ;;  %2585 = vmatprep.mubr.msk.f32.mxu0 %vm3149_vm1, %v3150_v7  ;;  %v839_v50 = vpop.permute.xlu1 %838 }
 0xb7b   : > { %2726 = vmatprep.subr.bf16.mxu0 %v3148_v4 }
 0xb7e   : > { %2728 = vmatpush3.bf16.msra.mxu0 %v3376_v8 }
 0xc4c   : > { %v824_v40 = vpop.f32.mrb[4].mxu0 }
 0xc4d   : > { %v828_v41 = vadd.f32 %v2376_v39, %v824_v40  ;;  %v2565_v42 = vpop.f32.mrb[5].mxu0 }
 0xc4f   : > { %2899 = vtanh.f32 %v828_v41  ;;  %v2378_v44 = vmul.f32 -1.442695, %v828_v41  ;;  %v2388_v41 = vld [vmem:[%s3344_s5 + $0x38] sm:$0xff] }
 0xc51   : > { %2901 = vpow2.f32 %v2378_v44 }
 0xc59   : > { %v2900_v43 = vpop.eup %2899 }
 0xc5a   : > { %843 = vrot.lane.b32.xlu0 %v2900_v43, %s3151_s21 }
 0xc5b   : > { %v2902_v45 = vpop.eup %2901 }
 0xc5c   : > { %v832_v46 = vadd.f32 1.0, %v2902_v45 }
 0xc5e   : > { %2903 = vrcp.f32 %v832_v46 }
 0xc68   : > { %v2904_v47 = vpop.eup %2903 }
 0xc69   : > { %v841_v51 = vmul.f32 %v2904_v47, %v839_v50 }
 0xccc   : > { %v844_v48 = vpop.permute.xlu0 %843 }
 0xccd   : > { %v846_v49 = vmul.f32 %v2904_v47, %v844_v48 }
 0xccf   : > { %848 = vrot.lane.b32.xlu0 %v846_v49, %s3151_s21 }
 0xd41   : > { %v849_v52 = vpop.permute.xlu0 %848 }
 0xd42   : > { %v851_v53 = vadd.f32 %v849_v52, %v841_v51 }
 0xd44   : > { %2905 = vtanh.f32 %v851_v53 }
 0xd4e   : > { %v2906_v54 = vpop.eup %2905 }
 0xd4f   : > { %854 = vrot.lane.b32.xlu1 %v2906_v54, %s3151_s21 }
 0xd53   : > { %859 = vrot.lane.b32.xlu1 %v851_v53, %s3152_s19 }
 0xdc1   : > { %v855_v55 = vpop.permute.xlu1 %854 }
 0xdc2   : > { %v857_v56 = vmul.f32 %v2904_v47, %v855_v55 }
 0xdc4   : > { %864 = vrot.lane.b32.xlu0 %v857_v56, %s3153_s26 }
 0xdc5   : > { %v860_v57 = vpop.permute.xlu1 %859 }
 0xdc6   : > { %862 = vst.msk [vmem:[#allocation3] sm:$0xff] %vm254_vm0, %v860_v57 }
 0xdcd   : > { %v958_v58 = vld [vmem:[#allocation3] sm:$0xff] }
 0xdce   : > { %960 = vrot.lane.b32.xlu1 %v958_v58, %s3151_s21 }
 0xe36   : > { %v865_v59 = vpop.permute.xlu0 %864 }
 0xe37   : > { %867 = vst.msk [vmem:[#allocation2] sm:$0xff] %vm254_vm0, %v865_v59  ;;  %2379 = vst.msk [vmem:[%s3360_s15 + $0x20] sm:$0xff] %vm254_vm0, %v865_v59 }
 0xe3e   : > { %v872_v60 = vld [vmem:[#allocation2] sm:$0xff] }
 0xe3f   : > { %2575 = vmatmul.mubr.msk.f32.vlgmr.msra.gmra.mrb[4].mxu1 %vm254_vm0, %v872_v60 }
 0xe40   : > { %2731 = vmatpush3.bf16.msra.mxu1 %v3367_v5  ;;  %2596 = vmatprep.mubr.msk.f32.mxu1 %vm3149_vm1, %v3150_v7 }
 0xe41   : > { %2732 = vmatprep.subr.bf16.mxu1 %v3148_v4  ;;  %v961_v4 = vpop.permute.xlu1 %960 }
 0xe44   : > { %2734 = vmatpush3.bf16.msra.mxu1 %v3376_v8 }
 0xf12   : > { %v946_v62 = vpop.f32.mrb[4].mxu1 }
 0xf13   : > { %v950_v63 = vadd.f32 %v2380_v61, %v946_v62  ;;  %v2576_v0 = vpop.f32.mrb[5].mxu1 }
 0xf15   : > { %2907 = vtanh.f32 %v950_v63  ;;  %v2382_v2 = vmul.f32 -1.442695, %v950_v63 }
 0xf17   : > { %2909 = vpow2.f32 %v2382_v2 }
 0xf1f   : > { %v2908_v1 = vpop.eup %2907 }
 0xf20   : > { %965 = vrot.lane.b32.xlu0 %v2908_v1, %s3151_s21 }
 0xf21   : > { %v2910_v3 = vpop.eup %2909 }
 0xf22   : > { %v954_v6 = vadd.f32 1.0, %v2910_v3 }
 0xf24   : > { %2911 = vrcp.f32 %v954_v6 }
 0xf2e   : > { %v2912_v5 = vpop.eup %2911 }
 0xf2f   : > { %v963_v8 = vmul.f32 %v2912_v5, %v961_v4 }
 0xf92   : > { %v966_v9 = vpop.permute.xlu0 %965 }
 0xf93   : > { %v968_v7 = vmul.f32 %v2912_v5, %v966_v9 }
 0xf95   : > { %970 = vrot.lane.b32.xlu0 %v968_v7, %s3151_s21 }
0x1007   : > { %v971_v10 = vpop.permute.xlu0 %970 }
0x1008   : > { %v973_v11 = vadd.f32 %v971_v10, %v963_v8 }
0x100a   : > { %2913 = vtanh.f32 %v973_v11 }
0x1014   : > { %v2914_v12 = vpop.eup %2913 }
0x1015   : > { %976 = vrot.lane.b32.xlu1 %v2914_v12, %s3151_s21 }
0x1019   : > { %981 = vrot.lane.b32.xlu1 %v973_v11, %s3152_s19 }
0x1087   : > { %v977_v13 = vpop.permute.xlu1 %976 }
0x1088   : > { %v979_v14 = vmul.f32 %v2912_v5, %v977_v13 }
0x108a   : > { %986 = vrot.lane.b32.xlu0 %v979_v14, %s3153_s26 }
0x108b   : > { %v982_v15 = vpop.permute.xlu1 %981 }
0x108c   : > { %984 = vst.msk [vmem:[#allocation3] sm:$0xff] %vm254_vm0, %v982_v15 }
0x1093   : > { %v1080_v16 = vld [vmem:[#allocation3] sm:$0xff] }
0x1094   : > { %1082 = vrot.lane.b32.xlu1 %v1080_v16, %s3151_s21 }
0x10fc   : > { %v987_v17 = vpop.permute.xlu0 %986 }
0x10fd   : > { %989 = vst.msk [vmem:[#allocation2] sm:$0xff] %vm254_vm0, %v987_v17  ;;  %2383 = vst.msk [vmem:[%s3360_s15 + $0x28] sm:$0xff] %vm254_vm0, %v987_v17 }
0x1104   : > { %v994_v18 = vld [vmem:[#allocation2] sm:$0xff] }
0x1105   : > { %2586 = vmatmul.mubr.msk.f32.vlgmr.msra.gmra.mrb[6].mxu0 %vm254_vm0, %v994_v18 }
0x1106   : > { %v1083_v30 = vpop.permute.xlu1 %1082 }
0x11d8   : > { %v1068_v20 = vpop.f32.mrb[6].mxu0 }
0x11d9   : > { %v1072_v21 = vadd.f32 %v2384_v19, %v1068_v20  ;;  %v2587_v22 = vpop.f32.mrb[7].mxu0 }
0x11db   : > { %2915 = vtanh.f32 %v1072_v21  ;;  %v2386_v24 = vmul.f32 -1.442695, %v1072_v21 }
0x11dd   : > { %2917 = vpow2.f32 %v2386_v24 }
0x11e5   : > { %v2916_v23 = vpop.eup %2915 }
0x11e6   : > { %1087 = vrot.lane.b32.xlu0 %v2916_v23, %s3151_s21 }
0x11e7   : > { %v2918_v25 = vpop.eup %2917 }
0x11e8   : > { %v1076_v26 = vadd.f32 1.0, %v2918_v25 }
0x11ea   : > { %2919 = vrcp.f32 %v1076_v26 }
0x11f4   : > { %v2920_v27 = vpop.eup %2919 }
0x11f5   : > { %v1085_v31 = vmul.f32 %v2920_v27, %v1083_v30 }
0x1258   : > { %v1088_v28 = vpop.permute.xlu0 %1087 }
0x1259   : > { %v1090_v29 = vmul.f32 %v2920_v27, %v1088_v28 }
0x125b   : > { %1092 = vrot.lane.b32.xlu0 %v1090_v29, %s3151_s21 }
0x12cd   : > { %v1093_v32 = vpop.permute.xlu0 %1092 }
0x12ce   : > { %v1095_v33 = vadd.f32 %v1093_v32, %v1085_v31 }
0x12d0   : > { %2921 = vtanh.f32 %v1095_v33 }
0x12da   : > { %v2922_v34 = vpop.eup %2921 }
0x12db   : > { %1098 = vrot.lane.b32.xlu1 %v2922_v34, %s3151_s21 }
0x12df   : > { %1103 = vrot.lane.b32.xlu1 %v1095_v33, %s3152_s19 }
0x134d   : > { %v1099_v35 = vpop.permute.xlu1 %1098 }
0x134e   : > { %v1101_v36 = vmul.f32 %v2920_v27, %v1099_v35 }
0x1350   : > { %1108 = vrot.lane.b32.xlu0 %v1101_v36, %s3153_s26 }
0x1351   : > { %v1104_v37 = vpop.permute.xlu1 %1103 }
0x1352   : > { %1106 = vst.msk [vmem:[#allocation3] sm:$0xff] %vm254_vm0, %v1104_v37 }
0x1359   : > { %v1202_v38 = vld [vmem:[#allocation3] sm:$0xff] }
0x135a   : > { %1204 = vrot.lane.b32.xlu1 %v1202_v38, %s3151_s21 }
0x13c2   : > { %v1109_v39 = vpop.permute.xlu0 %1108 }
0x13c3   : > { %1111 = vst.msk [vmem:[#allocation2] sm:$0xff] %vm254_vm0, %v1109_v39  ;;  %2387 = vst.msk [vmem:[%s3360_s15 + $0x30] sm:$0xff] %vm254_vm0, %v1109_v39 }
0x13ca   : > { %v1116_v40 = vld [vmem:[#allocation2] sm:$0xff] }
0x13cb   : > { %2597 = vmatmul.mubr.msk.f32.vlgmr.msra.gmra.mrb[6].mxu1 %vm254_vm0, %v1116_v40 }
0x13cc   : > { %v1205_v52 = vpop.permute.xlu1 %1204 }
0x149e   : > { %v1190_v42 = vpop.f32.mrb[6].mxu1 }
0x149f   : > { %v1194_v43 = vadd.f32 %v2388_v41, %v1190_v42  ;;  %v2598_v44 = vpop.f32.mrb[7].mxu1 }
0x14a1   : > { %2923 = vtanh.f32 %v1194_v43  ;;  %v2390_v46 = vmul.f32 -1.442695, %v1194_v43 }
0x14a3   : > { %2925 = vpow2.f32 %v2390_v46 }
0x14ab   : > { %v2924_v45 = vpop.eup %2923 }
0x14ac   : > { %1209 = vrot.lane.b32.xlu0 %v2924_v45, %s3151_s21 }
0x14ad   : > { %v2926_v47 = vpop.eup %2925 }
0x14ae   : > { %v1198_v48 = vadd.f32 1.0, %v2926_v47 }
0x14b0   : > { %2927 = vrcp.f32 %v1198_v48 }
0x14ba   : > { %v2928_v49 = vpop.eup %2927 }
0x14bb   : > { %v1207_v53 = vmul.f32 %v2928_v49, %v1205_v52 }
0x151e   : > { %v1210_v50 = vpop.permute.xlu0 %1209 }
0x151f   : > { %v1212_v51 = vmul.f32 %v2928_v49, %v1210_v50 }
0x1521   : > { %1214 = vrot.lane.b32.xlu0 %v1212_v51, %s3151_s21 }
0x1593   : > { %v1215_v54 = vpop.permute.xlu0 %1214 }
0x1594   : > { %v1217_v55 = vadd.f32 %v1215_v54, %v1207_v53 }
0x1596   : > { %2929 = vtanh.f32 %v1217_v55  ;;  %1225 = vrot.lane.b32.xlu0 %v1217_v55, %s3152_s19 }
0x15a0   : > { %v2930_v56 = vpop.eup %2929 }
0x15a1   : > { %1220 = vrot.lane.b32.xlu1 %v2930_v56, %s3151_s21 }
0x1608   : > { %v1226_v57 = vpop.permute.xlu0 %1225 }
0x1609   : > { %1228 = vst.msk [vmem:[#allocation3] sm:$0xff] %vm254_vm0, %v1226_v57 }
0x1613   : > { %v1221_v58 = vpop.permute.xlu1 %1220 }
0x1614   : > { %v1223_v59 = vmul.f32 %v2928_v49, %v1221_v58 }
0x1616   : > { %1230 = vrot.lane.b32.xlu1 %v1223_v59, %s3153_s26 }
0x1688   : > { %v1231_v60 = vpop.permute.xlu1 %1230 }
0x1689   : > { %1233 = vst.msk [vmem:[#allocation2] sm:$0xff] %vm254_vm0, %v1231_v60  ;;  %2391 = vst.msk [vmem:[%s3360_s15 + $0x38] sm:$0xff] %vm254_vm0, %v1231_v60 }
0x168a PF: > { %p2392_p3 = scmp.eq.s32.totalorder %s3133_s12, 0 }
0x168b   : > { %v1243_v61 = vld [vmem:[%s3352_s3] sm:$0xff] (!%p2392_p3)  ;;  %v1244_v62 = vld [vmem:[%s3352_s3 + $0x8] sm:$0xff] (!%p2392_p3)  ;;  %v1245_v63 = vld [vmem:[%s3352_s3 + $0x10] sm:$0xff] (!%p2392_p3)  ;;  %v3154_v0 = vmov (!%p2392_p3), 0.0|0.0   ;;  %vm3155_vm2 = vmmov (!%p2392_p3), 0   ;;  %v3156_v3 = vmov (!%p2392_p3), 0.0  }
0x168c   : > { %1239 = sbr.rel (%p2392_p3) target bundleno = 11454 (0x2cbe), region = 48  ;;  %2735 = vmatprep.subr.bf16.mxu0 (!%p2392_p3), %v3154_v0  ;;  %v3520_v1 = vpack.c.bf16 (!%p2392_p3), %v1244_v62, %v1243_v61  ;;  %v1246_v2 = vld [vmem:[%s3352_s3 + $0x18] sm:$0xff] (!%p2392_p3)  ;;  %2607 = vmatprep.mubr.msk.f32.mxu0 (!%p2392_p3), %vm3155_vm2, %v3156_v3  ;;  %s3157_s30 = smov (!%p2392_p3), 32   ;;  %v2397_v29 = vld [vmem:[%s3344_s5 + $0x30] sm:$0xff] (!%p2392_p3)  ;;  %v2401_v51 = vld [vmem:[%s3344_s5 + $0x28] sm:$0xff] (!%p2392_p3) }
0x168d   : > { %2741 = vmatprep.subr.bf16.mxu1 (!%p2392_p3), %v3154_v0  ;;  %2618 = vmatprep.mubr.msk.f32.mxu1 (!%p2392_p3), %vm3155_vm2, %v3156_v3  ;;  %v3529_v6 = vpack.c.bf16 (!%p2392_p3), %v1246_v2, %v1245_v63  ;;  %v2393_v9 = vld [vmem:[%s3344_s5 + $0x38] sm:$0xff] (!%p2392_p3)  ;;  %s3158_s8 = smov (!%p2392_p3), 96   ;;  %s3159_s16 = smov (!%p2392_p3), 64  }
0x168e   : > { %2737 = vmatpush3.bf16.msra.mxu0 (!%p2392_p3), %v3520_v1  ;;  %2743 = vmatpush3.bf16.msra.mxu1 (!%p2392_p3), %v3520_v1  ;;  %v1329_v11 = vld [vmem:[#allocation3] sm:$0xff] (!%p2392_p3) }
0x168f   : > { %2738 = vmatprep.subr.bf16.mxu0 (!%p2392_p3), %v3154_v0  ;;  %2744 = vmatprep.subr.bf16.mxu1 (!%p2392_p3), %v3154_v0 }
0x1690   : > { %v1242_v5 = vld [vmem:[#allocation2] sm:$0xff] (!%p2392_p3) }
0x1692   : > { %2740 = vmatpush3.bf16.msra.mxu0 (!%p2392_p3), %v3529_v6  ;;  %2746 = vmatpush3.bf16.msra.mxu1 (!%p2392_p3), %v3529_v6 }
0x1693   : > { %2747 = vmatprep.subr.bf16.mxu0 %v3154_v0  ;;  %2753 = vmatprep.subr.bf16.mxu1 %v3154_v0 }
0x1695   : > { %2608 = vmatmul.mubr.msk.f32.vlgmr.msra.gmra.mrb[0].mxu0 %vm254_vm0, %v1242_v5 }
0x1696   : > { %2749 = vmatpush3.bf16.msra.mxu0 %v3520_v1  ;;  %2629 = vmatprep.mubr.msk.f32.mxu0 %vm3155_vm2, %v3156_v3 }
0x1697   : > { %2750 = vmatprep.subr.bf16.mxu0 %v3154_v0 }
0x169a   : > { %2752 = vmatpush3.bf16.msra.mxu0 %v3529_v6 }
0x169b   : > { %2759 = vmatprep.subr.bf16.mxu0 %v3154_v0 }
0x1768   : > { %v1317_v7 = vpop.f32.mrb[0].mxu0 }
0x1769   : > { %v1321_v4 = vadd.f32 %v2393_v9, %v1317_v7  ;;  %v2609_v8 = vpop.f32.mrb[1].mxu0 }
0x176b   : > { %2931 = vtanh.f32 %v1321_v4  ;;  %v2395_v12 = vmul.f32 -1.442695, %v1321_v4 }
0x176d   : > { %2933 = vpow2.f32 %v2395_v12 }
0x1775   : > { %v2932_v10 = vpop.eup %2931 }
0x1776   : > { %1336 = vrot.lane.b32.xlu0 %v2932_v10, %s3157_s30 }
0x1777   : > { %v2934_v13 = vpop.eup %2933 }
0x1778   : > { %v1325_v14 = vadd.f32 1.0, %v2934_v13  ;;  %v2405_v13 = vld [vmem:[%s3344_s5 + $0x20] sm:$0xff] }
0x177a   : > { %1331 = vrot.lane.b32.xlu0 %v1329_v11, %s3157_s30  ;;  %2935 = vrcp.f32 %v1325_v14 }
0x1784   : > { %v2936_v15 = vpop.eup %2935 }
0x17e8   : > { %v1337_v16 = vpop.permute.xlu0 %1336 }
0x17e9   : > { %v1339_v17 = vmul.f32 %v2936_v15, %v1337_v16 }
0x17eb   : > { %1341 = vrot.lane.b32.xlu1 %v1339_v17, %s3157_s30 }
0x17ec   : > { %v1332_v18 = vpop.permute.xlu0 %1331 }
0x17ed   : > { %v1334_v19 = vmul.f32 %v2936_v15, %v1332_v18 }
0x185d   : > { %v1342_v20 = vpop.permute.xlu1 %1341 }
0x185e   : > { %v1344_v21 = vadd.f32 %v1342_v20, %v1334_v19 }
0x1860   : > { %2937 = vtanh.f32 %v1344_v21 }
0x186a   : > { %v2938_v22 = vpop.eup %2937 }
0x186b   : > { %1347 = vrot.lane.b32.xlu1 %v2938_v22, %s3157_s30 }
0x186f   : > { %1352 = vrot.lane.b32.xlu1 %v1344_v21, %s3158_s8 }
0x18dd   : > { %v1348_v23 = vpop.permute.xlu1 %1347 }
0x18de   : > { %v1350_v24 = vmul.f32 %v2936_v15, %v1348_v23 }
0x18e0   : > { %1357 = vrot.lane.b32.xlu0 %v1350_v24, %s3159_s16 }
0x18e1   : > { %v1353_v25 = vpop.permute.xlu1 %1352 }
0x18e2   : > { %1355 = vst.msk [vmem:[#allocation3] sm:$0xff] %vm254_vm0, %v1353_v25 }
0x18e9   : > { %v1451_v26 = vld [vmem:[#allocation3] sm:$0xff] }
0x18ea   : > { %1453 = vrot.lane.b32.xlu1 %v1451_v26, %s3157_s30 }
0x1952   : > { %v1358_v27 = vpop.permute.xlu0 %1357 }
0x1953   : > { %1360 = vst.msk [vmem:[#allocation2] sm:$0xff] %vm254_vm0, %v1358_v27  ;;  %2396 = vst.msk [vmem:[%s3360_s15 + $0x38] sm:$0xff] %vm254_vm0, %v1358_v27 }
0x195a   : > { %v1365_v28 = vld [vmem:[#allocation2] sm:$0xff] }
0x195b   : > { %2619 = vmatmul.mubr.msk.f32.vlgmr.msra.gmra.mrb[0].mxu1 %vm254_vm0, %v1365_v28 }
0x195c   : > { %2755 = vmatpush3.bf16.msra.mxu1 %v3520_v1  ;;  %2640 = vmatprep.mubr.msk.f32.mxu1 %vm3155_vm2, %v3156_v3  ;;  %v1454_v40 = vpop.permute.xlu1 %1453 }
0x195d   : > { %2756 = vmatprep.subr.bf16.mxu1 %v3154_v0 }
0x1960   : > { %2758 = vmatpush3.bf16.msra.mxu1 %v3529_v6 }
0x1961   : > { %2765 = vmatprep.subr.bf16.mxu1 %v3154_v0 }
0x1a2e   : > { %v1439_v30 = vpop.f32.mrb[0].mxu1 }
0x1a2f   : > { %v1443_v31 = vadd.f32 %v2397_v29, %v1439_v30  ;;  %v2620_v32 = vpop.f32.mrb[1].mxu1 }
0x1a31   : > { %2939 = vtanh.f32 %v1443_v31  ;;  %v2399_v34 = vmul.f32 -1.442695, %v1443_v31 }
0x1a33   : > { %2941 = vpow2.f32 %v2399_v34 }
0x1a3b   : > { %v2940_v33 = vpop.eup %2939 }
0x1a3c   : > { %1458 = vrot.lane.b32.xlu0 %v2940_v33, %s3157_s30 }
0x1a3d   : > { %v2942_v35 = vpop.eup %2941 }
0x1a3e   : > { %v1447_v36 = vadd.f32 1.0, %v2942_v35  ;;  %v2409_v35 = vld [vmem:[%s3344_s5 + $0x18] sm:$0xff] }
0x1a40   : > { %2943 = vrcp.f32 %v1447_v36 }
0x1a4a   : > { %v2944_v37 = vpop.eup %2943 }
0x1a4b   : > { %v1456_v41 = vmul.f32 %v2944_v37, %v1454_v40 }
0x1aae   : > { %v1459_v38 = vpop.permute.xlu0 %1458 }
0x1aaf   : > { %v1461_v39 = vmul.f32 %v2944_v37, %v1459_v38 }
0x1ab1   : > { %1463 = vrot.lane.b32.xlu0 %v1461_v39, %s3157_s30 }
0x1b23   : > { %v1464_v42 = vpop.permute.xlu0 %1463 }
0x1b24   : > { %v1466_v43 = vadd.f32 %v1464_v42, %v1456_v41 }
0x1b26   : > { %2945 = vtanh.f32 %v1466_v43 }
0x1b30   : > { %v2946_v44 = vpop.eup %2945 }
0x1b31   : > { %1469 = vrot.lane.b32.xlu1 %v2946_v44, %s3157_s30 }
0x1b35   : > { %1474 = vrot.lane.b32.xlu1 %v1466_v43, %s3158_s8 }
0x1ba3   : > { %v1470_v45 = vpop.permute.xlu1 %1469 }
0x1ba4   : > { %v1472_v46 = vmul.f32 %v2944_v37, %v1470_v45 }
0x1ba6   : > { %1479 = vrot.lane.b32.xlu0 %v1472_v46, %s3159_s16 }
0x1ba7   : > { %v1475_v47 = vpop.permute.xlu1 %1474 }
0x1ba8   : > { %1477 = vst.msk [vmem:[#allocation3] sm:$0xff] %vm254_vm0, %v1475_v47 }
0x1baf   : > { %v1573_v48 = vld [vmem:[#allocation3] sm:$0xff] }
0x1bb0   : > { %1575 = vrot.lane.b32.xlu1 %v1573_v48, %s3157_s30 }
0x1c18   : > { %v1480_v49 = vpop.permute.xlu0 %1479 }
0x1c19   : > { %1482 = vst.msk [vmem:[#allocation2] sm:$0xff] %vm254_vm0, %v1480_v49  ;;  %2400 = vst.msk [vmem:[%s3360_s15 + $0x30] sm:$0xff] %vm254_vm0, %v1480_v49 }
0x1c20   : > { %v1487_v50 = vld [vmem:[#allocation2] sm:$0xff] }
0x1c21   : > { %2630 = vmatmul.mubr.msk.f32.vlgmr.msra.gmra.mrb[2].mxu0 %vm254_vm0, %v1487_v50 }
0x1c22   : > { %2761 = vmatpush3.bf16.msra.mxu0 %v3520_v1  ;;  %2651 = vmatprep.mubr.msk.f32.mxu0 %vm3155_vm2, %v3156_v3  ;;  %v1576_v62 = vpop.permute.xlu1 %1575 }
0x1c23   : > { %2762 = vmatprep.subr.bf16.mxu0 %v3154_v0 }
0x1c26   : > { %2764 = vmatpush3.bf16.msra.mxu0 %v3529_v6 }
0x1c27   : > { %2771 = vmatprep.subr.bf16.mxu0 %v3154_v0 }
0x1cf4   : > { %v1561_v52 = vpop.f32.mrb[2].mxu0 }
0x1cf5   : > { %v1565_v53 = vadd.f32 %v2401_v51, %v1561_v52  ;;  %v2631_v54 = vpop.f32.mrb[3].mxu0 }
0x1cf7   : > { %2947 = vtanh.f32 %v1565_v53  ;;  %v2403_v56 = vmul.f32 -1.442695, %v1565_v53 }
0x1cf9   : > { %2949 = vpow2.f32 %v2403_v56 }
0x1d01   : > { %v2948_v55 = vpop.eup %2947 }
0x1d02   : > { %1580 = vrot.lane.b32.xlu0 %v2948_v55, %s3157_s30 }
0x1d03   : > { %v2950_v57 = vpop.eup %2949 }
0x1d04   : > { %v1569_v58 = vadd.f32 1.0, %v2950_v57  ;;  %v2413_v57 = vld [vmem:[%s3344_s5 + $0x10] sm:$0xff] }
0x1d06   : > { %2951 = vrcp.f32 %v1569_v58 }
0x1d10   : > { %v2952_v59 = vpop.eup %2951 }
0x1d11   : > { %v1578_v63 = vmul.f32 %v2952_v59, %v1576_v62 }
0x1d74   : > { %v1581_v60 = vpop.permute.xlu0 %1580 }
0x1d75   : > { %v1583_v61 = vmul.f32 %v2952_v59, %v1581_v60 }
0x1d77   : > { %1585 = vrot.lane.b32.xlu0 %v1583_v61, %s3157_s30 }
0x1de9   : > { %v1586_v2 = vpop.permute.xlu0 %1585 }
0x1dea   : > { %v1588_v5 = vadd.f32 %v1586_v2, %v1578_v63 }
0x1dec   : > { %2953 = vtanh.f32 %v1588_v5 }
0x1df6   : > { %v2954_v9 = vpop.eup %2953 }
0x1df7   : > { %1591 = vrot.lane.b32.xlu1 %v2954_v9, %s3157_s30 }
0x1dfb   : > { %1596 = vrot.lane.b32.xlu1 %v1588_v5, %s3158_s8 }
0x1e69   : > { %v1592_v7 = vpop.permute.xlu1 %1591 }
0x1e6a   : > { %v1594_v4 = vmul.f32 %v2952_v59, %v1592_v7 }
0x1e6c   : > { %1601 = vrot.lane.b32.xlu0 %v1594_v4, %s3159_s16 }
0x1e6d   : > { %v1597_v8 = vpop.permute.xlu1 %1596 }
0x1e6e   : > { %1599 = vst.msk [vmem:[#allocation3] sm:$0xff] %vm254_vm0, %v1597_v8 }
0x1e75   : > { %v1695_v10 = vld [vmem:[#allocation3] sm:$0xff] }
0x1e76   : > { %1697 = vrot.lane.b32.xlu1 %v1695_v10, %s3157_s30 }
0x1ede   : > { %v1602_v11 = vpop.permute.xlu0 %1601 }
0x1edf   : > { %1604 = vst.msk [vmem:[#allocation2] sm:$0xff] %vm254_vm0, %v1602_v11  ;;  %2404 = vst.msk [vmem:[%s3360_s15 + $0x28] sm:$0xff] %vm254_vm0, %v1602_v11 }
0x1ee6   : > { %v1609_v12 = vld [vmem:[#allocation2] sm:$0xff] }
0x1ee7   : > { %2641 = vmatmul.mubr.msk.f32.vlgmr.msra.gmra.mrb[2].mxu1 %vm254_vm0, %v1609_v12 }
0x1ee8   : > { %2767 = vmatpush3.bf16.msra.mxu1 %v3520_v1  ;;  %2662 = vmatprep.mubr.msk.f32.mxu1 %vm3155_vm2, %v3156_v3  ;;  %v1698_v24 = vpop.permute.xlu1 %1697 }
0x1ee9   : > { %2768 = vmatprep.subr.bf16.mxu1 %v3154_v0 }
0x1eec   : > { %2770 = vmatpush3.bf16.msra.mxu1 %v3529_v6 }
0x1eed   : > { %2777 = vmatprep.subr.bf16.mxu1 %v3154_v0 }
0x1fba   : > { %v1683_v14 = vpop.f32.mrb[2].mxu1 }
0x1fbb   : > { %v1687_v15 = vadd.f32 %v2405_v13, %v1683_v14  ;;  %v2642_v16 = vpop.f32.mrb[3].mxu1 }
0x1fbd   : > { %2955 = vtanh.f32 %v1687_v15  ;;  %v2407_v18 = vmul.f32 -1.442695, %v1687_v15  ;;  %v2417_v15 = vld [vmem:[%s3344_s5 + $0x8] sm:$0xff] }
0x1fbf   : > { %2957 = vpow2.f32 %v2407_v18 }
0x1fc7   : > { %v2956_v17 = vpop.eup %2955 }
0x1fc8   : > { %1702 = vrot.lane.b32.xlu0 %v2956_v17, %s3157_s30 }
0x1fc9   : > { %v2958_v19 = vpop.eup %2957 }
0x1fca   : > { %v1691_v20 = vadd.f32 1.0, %v2958_v19 }
0x1fcc   : > { %2959 = vrcp.f32 %v1691_v20 }
0x1fd6   : > { %v2960_v21 = vpop.eup %2959 }
0x1fd7   : > { %v1700_v25 = vmul.f32 %v2960_v21, %v1698_v24 }
0x203a   : > { %v1703_v22 = vpop.permute.xlu0 %1702 }
0x203b   : > { %v1705_v23 = vmul.f32 %v2960_v21, %v1703_v22 }
0x203d   : > { %1707 = vrot.lane.b32.xlu0 %v1705_v23, %s3157_s30 }
0x20af   : > { %v1708_v26 = vpop.permute.xlu0 %1707 }
0x20b0   : > { %v1710_v27 = vadd.f32 %v1708_v26, %v1700_v25 }
0x20b2   : > { %2961 = vtanh.f32 %v1710_v27 }
0x20bc   : > { %v2962_v28 = vpop.eup %2961 }
0x20bd   : > { %1713 = vrot.lane.b32.xlu1 %v2962_v28, %s3157_s30 }
0x20c1   : > { %1718 = vrot.lane.b32.xlu1 %v1710_v27, %s3158_s8 }
0x212f   : > { %v1714_v29 = vpop.permute.xlu1 %1713 }
0x2130   : > { %v1716_v30 = vmul.f32 %v2960_v21, %v1714_v29 }
0x2132   : > { %1723 = vrot.lane.b32.xlu0 %v1716_v30, %s3159_s16 }
0x2133   : > { %v1719_v31 = vpop.permute.xlu1 %1718 }
0x2134   : > { %1721 = vst.msk [vmem:[#allocation3] sm:$0xff] %vm254_vm0, %v1719_v31 }
0x213b   : > { %v1817_v32 = vld [vmem:[#allocation3] sm:$0xff] }
0x213c   : > { %1819 = vrot.lane.b32.xlu1 %v1817_v32, %s3157_s30 }
0x21a4   : > { %v1724_v33 = vpop.permute.xlu0 %1723 }
0x21a5   : > { %1726 = vst.msk [vmem:[#allocation2] sm:$0xff] %vm254_vm0, %v1724_v33  ;;  %2408 = vst.msk [vmem:[%s3360_s15 + $0x20] sm:$0xff] %vm254_vm0, %v1724_v33 }
0x21ac   : > { %v1731_v34 = vld [vmem:[#allocation2] sm:$0xff] }
0x21ad   : > { %2652 = vmatmul.mubr.msk.f32.vlgmr.msra.gmra.mrb[4].mxu0 %vm254_vm0, %v1731_v34 }
0x21ae   : > { %2773 = vmatpush3.bf16.msra.mxu0 %v3520_v1  ;;  %2673 = vmatprep.mubr.msk.f32.mxu0 %vm3155_vm2, %v3156_v3  ;;  %v1820_v46 = vpop.permute.xlu1 %1819 }
0x21af   : > { %2774 = vmatprep.subr.bf16.mxu0 %v3154_v0 }
0x21b2   : > { %2776 = vmatpush3.bf16.msra.mxu0 %v3529_v6 }
0x2280   : > { %v1805_v36 = vpop.f32.mrb[4].mxu0 }
0x2281   : > { %v1809_v37 = vadd.f32 %v2409_v35, %v1805_v36  ;;  %v2653_v38 = vpop.f32.mrb[5].mxu0 }
0x2283   : > { %2963 = vtanh.f32 %v1809_v37  ;;  %v2411_v40 = vmul.f32 -1.442695, %v1809_v37  ;;  %v2095_v37 = vld [vmem:[%s3344_s5] sm:$0xff] }
0x2285   : > { %2965 = vpow2.f32 %v2411_v40 }
0x228d   : > { %v2964_v39 = vpop.eup %2963 }
0x228e   : > { %1824 = vrot.lane.b32.xlu0 %v2964_v39, %s3157_s30 }
0x228f   : > { %v2966_v41 = vpop.eup %2965 }
0x2290   : > { %v1813_v42 = vadd.f32 1.0, %v2966_v41 }
0x2292   : > { %2967 = vrcp.f32 %v1813_v42 }
0x229c   : > { %v2968_v43 = vpop.eup %2967 }
0x229d   : > { %v1822_v47 = vmul.f32 %v2968_v43, %v1820_v46 }
0x2300   : > { %v1825_v44 = vpop.permute.xlu0 %1824 }
0x2301   : > { %v1827_v45 = vmul.f32 %v2968_v43, %v1825_v44 }
0x2303   : > { %1829 = vrot.lane.b32.xlu0 %v1827_v45, %s3157_s30 }
0x2375   : > { %v1830_v48 = vpop.permute.xlu0 %1829 }
0x2376   : > { %v1832_v49 = vadd.f32 %v1830_v48, %v1822_v47 }
0x2378   : > { %2969 = vtanh.f32 %v1832_v49 }
0x2382   : > { %v2970_v50 = vpop.eup %2969 }
0x2383   : > { %1835 = vrot.lane.b32.xlu1 %v2970_v50, %s3157_s30 }
0x2387   : > { %1840 = vrot.lane.b32.xlu1 %v1832_v49, %s3158_s8 }
0x23f5   : > { %v1836_v51 = vpop.permute.xlu1 %1835 }
0x23f6   : > { %v1838_v52 = vmul.f32 %v2968_v43, %v1836_v51 }
0x23f8   : > { %1845 = vrot.lane.b32.xlu0 %v1838_v52, %s3159_s16 }
0x23f9   : > { %v1841_v53 = vpop.permute.xlu1 %1840 }
0x23fa   : > { %1843 = vst.msk [vmem:[#allocation3] sm:$0xff] %vm254_vm0, %v1841_v53 }
0x2401   : > { %v1939_v54 = vld [vmem:[#allocation3] sm:$0xff] }
0x2402   : > { %1941 = vrot.lane.b32.xlu1 %v1939_v54, %s3157_s30 }
0x246a   : > { %v1846_v55 = vpop.permute.xlu0 %1845 }
0x246b   : > { %1848 = vst.msk [vmem:[#allocation2] sm:$0xff] %vm254_vm0, %v1846_v55  ;;  %2412 = vst.msk [vmem:[%s3360_s15 + $0x18] sm:$0xff] %vm254_vm0, %v1846_v55 }
0x2472   : > { %v1853_v56 = vld [vmem:[#allocation2] sm:$0xff] }
0x2473   : > { %2663 = vmatmul.mubr.msk.f32.vlgmr.msra.gmra.mrb[4].mxu1 %vm254_vm0, %v1853_v56 }
0x2474   : > { %2779 = vmatpush3.bf16.msra.mxu1 %v3520_v1  ;;  %2684 = vmatprep.mubr.msk.f32.mxu1 %vm3155_vm2, %v3156_v3 }
0x2475   : > { %2780 = vmatprep.subr.bf16.mxu1 %v3154_v0  ;;  %v1942_v0 = vpop.permute.xlu1 %1941 }
0x2478   : > { %2782 = vmatpush3.bf16.msra.mxu1 %v3529_v6 }
0x2546   : > { %v1927_v58 = vpop.f32.mrb[4].mxu1 }
0x2547   : > { %v1931_v59 = vadd.f32 %v2413_v57, %v1927_v58  ;;  %v2664_v60 = vpop.f32.mrb[5].mxu1 }
0x2549   : > { %2971 = vtanh.f32 %v1931_v59  ;;  %v2415_v62 = vmul.f32 -1.442695, %v1931_v59 }
0x254b   : > { %2973 = vpow2.f32 %v2415_v62 }
0x2553   : > { %v2972_v61 = vpop.eup %2971 }
0x2554   : > { %1946 = vrot.lane.b32.xlu0 %v2972_v61, %s3157_s30 }
0x2555   : > { %v2974_v63 = vpop.eup %2973 }
0x2556   : > { %v1935_v2 = vadd.f32 1.0, %v2974_v63 }
0x2558   : > { %2975 = vrcp.f32 %v1935_v2 }
0x2562   : > { %v2976_v1 = vpop.eup %2975 }
0x2563   : > { %v1944_v6 = vmul.f32 %v2976_v1, %v1942_v0 }
0x25c6   : > { %v1947_v5 = vpop.permute.xlu0 %1946 }
0x25c7   : > { %v1949_v3 = vmul.f32 %v2976_v1, %v1947_v5 }
0x25c9   : > { %1951 = vrot.lane.b32.xlu0 %v1949_v3, %s3157_s30 }
0x263b   : > { %v1952_v9 = vpop.permute.xlu0 %1951 }
0x263c   : > { %v1954_v7 = vadd.f32 %v1952_v9, %v1944_v6 }
0x263e   : > { %2977 = vtanh.f32 %v1954_v7 }
0x2648   : > { %v2978_v4 = vpop.eup %2977 }
0x2649   : > { %1957 = vrot.lane.b32.xlu1 %v2978_v4, %s3157_s30 }
0x264d   : > { %1962 = vrot.lane.b32.xlu1 %v1954_v7, %s3158_s8 }
0x26bb   : > { %v1958_v8 = vpop.permute.xlu1 %1957 }
0x26bc   : > { %v1960_v10 = vmul.f32 %v2976_v1, %v1958_v8 }
0x26be   : > { %1967 = vrot.lane.b32.xlu0 %v1960_v10, %s3159_s16 }
0x26bf   : > { %v1963_v11 = vpop.permute.xlu1 %1962 }
0x26c0   : > { %1965 = vst.msk [vmem:[#allocation3] sm:$0xff] %vm254_vm0, %v1963_v11 }
0x26c7   : > { %v2061_v12 = vld [vmem:[#allocation3] sm:$0xff] }
0x26c8   : > { %2063 = vrot.lane.b32.xlu1 %v2061_v12, %s3157_s30 }
0x2730   : > { %v1968_v13 = vpop.permute.xlu0 %1967 }
0x2731   : > { %1970 = vst.msk [vmem:[#allocation2] sm:$0xff] %vm254_vm0, %v1968_v13  ;;  %2416 = vst.msk [vmem:[%s3360_s15 + $0x10] sm:$0xff] %vm254_vm0, %v1968_v13 }
0x2738   : > { %v1975_v14 = vld [vmem:[#allocation2] sm:$0xff] }
0x2739   : > { %2674 = vmatmul.mubr.msk.f32.vlgmr.msra.gmra.mrb[6].mxu0 %vm254_vm0, %v1975_v14 }
0x273a   : > { %v2064_v26 = vpop.permute.xlu1 %2063 }
0x280c   : > { %v2049_v16 = vpop.f32.mrb[6].mxu0 }
0x280d   : > { %v2053_v17 = vadd.f32 %v2417_v15, %v2049_v16  ;;  %v2675_v18 = vpop.f32.mrb[7].mxu0 }
0x280f   : > { %2979 = vtanh.f32 %v2053_v17  ;;  %v2419_v20 = vmul.f32 -1.442695, %v2053_v17 }
0x2811   : > { %2981 = vpow2.f32 %v2419_v20 }
0x2819   : > { %v2980_v19 = vpop.eup %2979 }
0x281a   : > { %2068 = vrot.lane.b32.xlu0 %v2980_v19, %s3157_s30 }
0x281b   : > { %v2982_v21 = vpop.eup %2981 }
0x281c   : > { %v2057_v22 = vadd.f32 1.0, %v2982_v21 }
0x281e   : > { %2983 = vrcp.f32 %v2057_v22 }
0x2828   : > { %v2984_v23 = vpop.eup %2983 }
0x2829   : > { %v2066_v27 = vmul.f32 %v2984_v23, %v2064_v26 }
0x288c   : > { %v2069_v24 = vpop.permute.xlu0 %2068 }
0x288d   : > { %v2071_v25 = vmul.f32 %v2984_v23, %v2069_v24 }
0x288f   : > { %2073 = vrot.lane.b32.xlu0 %v2071_v25, %s3157_s30 }
0x2901   : > { %v2074_v28 = vpop.permute.xlu0 %2073 }
0x2902   : > { %v2076_v29 = vadd.f32 %v2074_v28, %v2066_v27 }
0x2904   : > { %2985 = vtanh.f32 %v2076_v29 }
0x290e   : > { %v2986_v30 = vpop.eup %2985 }
0x290f   : > { %2079 = vrot.lane.b32.xlu1 %v2986_v30, %s3157_s30 }
0x2913   : > { %2084 = vrot.lane.b32.xlu1 %v2076_v29, %s3158_s8 }
0x2981   : > { %v2080_v31 = vpop.permute.xlu1 %2079 }
0x2982   : > { %v2082_v32 = vmul.f32 %v2984_v23, %v2080_v31 }
0x2984   : > { %2089 = vrot.lane.b32.xlu0 %v2082_v32, %s3159_s16 }
0x2985   : > { %v2085_v33 = vpop.permute.xlu1 %2084 }
0x2986   : > { %2087 = vst.msk [vmem:[#allocation3] sm:$0xff] %vm254_vm0, %v2085_v33 }
0x298d   : > { %v2182_v34 = vld [vmem:[#allocation3] sm:$0xff] }
0x298e   : > { %2184 = vrot.lane.b32.xlu1 %v2182_v34, %s3157_s30 }
0x29f6   : > { %v2090_v35 = vpop.permute.xlu0 %2089 }
0x29f7   : > { %2092 = vst.msk [vmem:[#allocation2] sm:$0xff] %vm254_vm0, %v2090_v35  ;;  %2420 = vst.msk [vmem:[%s3360_s15 + $0x8] sm:$0xff] %vm254_vm0, %v2090_v35 }
0x29fe   : > { %v2096_v36 = vld [vmem:[#allocation2] sm:$0xff] }
0x29ff   : > { %2685 = vmatmul.mubr.msk.f32.vlgmr.msra.gmra.mrb[6].mxu1 %vm254_vm0, %v2096_v36 }
0x2a00   : > { %v2185_v48 = vpop.permute.xlu1 %2184 }
0x2ad2   : > { %v2170_v38 = vpop.f32.mrb[6].mxu1 }
0x2ad3   : > { %v2174_v39 = vadd.f32 %v2170_v38, %v2095_v37  ;;  %v2686_v40 = vpop.f32.mrb[7].mxu1 }
0x2ad5   : > { %2987 = vtanh.f32 %v2174_v39  ;;  %v2422_v42 = vmul.f32 -1.442695, %v2174_v39 }
0x2ad7   : > { %2989 = vpow2.f32 %v2422_v42 }
0x2adf   : > { %v2988_v41 = vpop.eup %2987 }
0x2ae0   : > { %2189 = vrot.lane.b32.xlu0 %v2988_v41, %s3157_s30 }
0x2ae1   : > { %v2990_v43 = vpop.eup %2989 }
0x2ae2   : > { %v2178_v44 = vadd.f32 1.0, %v2990_v43 }
0x2ae4   : > { %2991 = vrcp.f32 %v2178_v44 }
0x2aee   : > { %v2992_v45 = vpop.eup %2991 }
0x2aef   : > { %v2187_v49 = vmul.f32 %v2992_v45, %v2185_v48 }
0x2b52   : > { %v2190_v46 = vpop.permute.xlu0 %2189 }
0x2b53   : > { %v2192_v47 = vmul.f32 %v2992_v45, %v2190_v46 }
0x2b55   : > { %2194 = vrot.lane.b32.xlu0 %v2192_v47, %s3157_s30 }
0x2bc7   : > { %v2195_v50 = vpop.permute.xlu0 %2194 }
0x2bc8   : > { %v2197_v51 = vadd.f32 %v2195_v50, %v2187_v49 }
0x2bca   : > { %2993 = vtanh.f32 %v2197_v51  ;;  %2205 = vrot.lane.b32.xlu0 %v2197_v51, %s3158_s8 }
0x2bd4   : > { %v2994_v52 = vpop.eup %2993 }
0x2bd5   : > { %2200 = vrot.lane.b32.xlu1 %v2994_v52, %s3157_s30 }
0x2c3c   : > { %v2206_v53 = vpop.permute.xlu0 %2205 }
0x2c3d   : > { %2208 = vst.msk [vmem:[#allocation3] sm:$0xff] %vm254_vm0, %v2206_v53 }
0x2c47   : > { %v2201_v54 = vpop.permute.xlu1 %2200 }
0x2c48   : > { %v2203_v55 = vmul.f32 %v2992_v45, %v2201_v54 }
0x2c4a   : > { %2210 = vrot.lane.b32.xlu1 %v2203_v55, %s3159_s16 }
0x2cbc   : > { %v2211_v56 = vpop.permute.xlu1 %2210 }
0x2cbd   : > { %2213 = vst.msk [vmem:[#allocation2] sm:$0xff] %vm254_vm0, %v2211_v56  ;;  %2214 = vst.msk [vmem:[%s3360_s15] sm:$0xff] %vm254_vm0, %v2211_v56 }
0x2cbe PF: > { %s2430_s7 = sshll.u32 %s3133_s12, 10  ;;  %s2235_s27 = sshll.u32 %s3360_s15, 4  ;;  %s3675_s27 = int_to_ptr.vmem [resolvable:$true] %s2235_s27 }
0x2cbf   : > { %s3672_s6 = scalar_lea.hbm %s3726_s2, %s2430_s7  ;;  %s2216_s28 = scalar_lea.sflag [#allocation6], %s3340_s4 }
0x2cc0   : > { %s3055_s5 = scalar_lea.vmem %s3675_s27, 1024  ;;  %p3737_p13 = scmp.ne.s32.totalorder %s3731_s22, 0 }
0x2cc1   : > { %p3056_p12 = scmp.ne.s32.totalorder %s3675_s27, %s3055_s5  ;;  %s3160_s25 = smov [#allocation9]  }
0x2cc2   : > { %s3059_s29 = sshll.u32 %s3160_s25, 4  ;;  %s3060_s29 = int_to_ptr.vmem [resolvable:$false] %s3059_s29 }
0x2cc3   : > { %p3057_p7 = pnand %p3056_p12, %p3737_p13  ;;  %s3061_s12 = scalar_lea.vmem %s3060_s29, 2048 }
0x2cc4   : > { %p3062_p9 = scmp.lt.s32.totalorder %s3675_s27, %s3060_s29  ;;  %p3063_p11 = scmp.lt.s32.totalorder %s3061_s12, %s3055_s5 }
0x2cc5   : > { %p3058_p10 = pneg %p3057_p7 }
0x2cc6   : > { %p3064_p1 = por %p3063_p11, %p3062_p9 }
0x2cc8   : > { %p3065_p6 = pnand %p3064_p1, %p3058_p10 }
0x2cca   : > { %3068 = shalt.err (!%p3065_p6)
}
0x2ccb   : > { %s3069_s3 = scalar_lea.hbm %s3672_s6, 1024  ;;  %s3073_s19 = scalar_lea.hbm %s3726_s2, 2048 }
0x2ccc   : > { %p3070_p2 = scmp.ne.s32.totalorder %s3672_s6, %s3069_s3  ;;  %p3074_p8 = scmp.lt.u32.totalorder %s3672_s6, %s3726_s2 }
0x2ccd   : > { %p3075_p0 = scmp.lt.u32.totalorder %s3073_s19, %s3069_s3  ;;  %p3077_p12 = scmp.lt.u32.totalorder %s3069_s3, %s3672_s6 }
0x2cce   : > { %p3071_p5 = pnand %p3070_p2, %p3737_p13 }
0x2ccf   : > { %p3076_p3 = por %p3075_p0, %p3074_p8 }
0x2cd0   : > { %p3072_p4 = pneg %p3071_p5 }
0x2cd1   : > { %p3078_p7 = por %p3077_p12, %p3076_p3 }
0x2cd3   : > { %p3079_p10 = pnand %p3078_p7, %p3072_p4 }
0x2cd5   : > { %3082 = shalt.err (!%p3079_p10)
}
0x2cd6   : > { %s3161_s8 = smov 128   ;;  %s3162_s16 = smov 8  }
0x2cd7   : > { %2787 = dma.vmem_to_hbm [thread:$0]  (%p3737_p13), %s3675_s27, 1024, %s3672_s6, %s2216_s28, %s3161_s8, %s3161_s8, %s3162_s16  }
0x2cd8 PF: > { %s2250_s7 = sand.u32 1, %s3121_s9   ;;  %p3738_p9 = scmp.ne.s32.totalorder %s3732_s24, 0 }
0x2cd9   : > { %p3739_p11 = scmp.ge.s32.totalorder %s3141_s14, 2  ;;  %s2251_s18 = scalar_lea.sflag [#allocation6], %s2250_s7 }
0x2cdb   : > { %p2797_p1 = pnand %p3739_p11, %p3738_p9 }
0x2cdd   : > { %3116 = dma.done.wait (!%p2797_p1), %s2251_s18, 1024  }
0x2cde   : > { %3118 = vsyncadd (!%p2797_p1), %s2251_s18, 4294966272  ;;  %s21_s14 = sadd.s32 1, %s3141_s14   ;;  %s3740_s9 = smov %s3125_s10 }
0x2cdf   : > { %p18_p6 = scmp.ge.s32.totalorder %s21_s14, 4   ;;  %s3741_s10 = smov %s3129_s11 }
0x2ce0   : > { %s3742_s11 = smov %s3234_s23  ;;  %s3743_s12 = smov %s3137_s13 }
0x2ce1   : > { %s3744_s13 = smov %s3746_s17  ;;  %20 = sbr.rel (!%p18_p6) target bundleno = 8 (0x8), region = 126 }
0x2ce8   :  { %2256 = vsyncpa [#allocation5], 1 }
0x2ce9   :  { %2258 = vsyncpa [#allocation5 + $0x1], 1 }
0x2cea   :  { %2259 = vsyncpa [#allocation8], 1 }
0x2ceb   :  { %2261 = vsyncpa [#allocation8 + $0x1], 1 }
0x2cec   :  { %2262 = vsyncpa [#allocation6], 1 }
0x2ced   :  { %2264 = vsyncpa [#allocation6 + $0x1], 1 }

</bundles_post_ra>
